<compile_context>
chip_gen: v7x
topology: tpu7x:2x2x1
jax: 0.10.0
libtpu: 0.0.40
codegen_flags: <defaults>
</compile_context>

<pallas_src>
import jax
import jax.numpy as jnp
from jax.experimental import pallas as pl
from jax.experimental.pallas import tpu as pltpu

# ---------------- small synthetic RoBERTa config ----------------
HIDDEN = 32          # roberta hidden_size (real: 768)
N_HEADS = 2
HEAD_DIM = HIDDEN // N_HEADS
FFN = 64             # intermediate size
N_LAYERS = 2
LN_EPS = 1e-5
VOCAB = 50           # tokenizer_len after resize_token_embeddings
MAX_POS = 16
NUM_MAIN = 4         # num_main_classes
NUM_SUB = 6          # num_sub_classes
OUT_PAD = 128        # lane-dense packed output width (main | sub | zero pad)

# TODO(synk): for real roberta-base sizes (H=768, FFN=3072, 12 layers) store the
# stacked weights in bf16 and tile the FFN matmuls over K so the resident
# weights fit v7x's 64 MiB VMEM; irrelevant at this toy size.


# ---------------- in-kernel helpers ----------------
def _layernorm(x, g, b):
    mu = jnp.mean(x, axis=-1, keepdims=True)
    var = jnp.mean((x - mu) ** 2, axis=-1, keepdims=True)
    return (x - mu) * jax.lax.rsqrt(var + LN_EPS) * g + b


def _gelu(x):
    # tanh-approx GELU (close to RoBERTa's activation)
    # TODO(synk): HF roberta-base uses exact erf GELU; outputs differ slightly.
    return 0.5 * x * (1.0 + jnp.tanh(0.7978845608028654 * (x + 0.044715 * x * x * x)))


# ---------------- single fused forward kernel ----------------
def role_classifier_kernel(x_ref, bias_ref, embg_ref, embb_ref,
                           wq_ref, bq_ref, wk_ref, bk_ref, wv_ref, bv_ref,
                           wo_ref, bo_ref, ln1g_ref, ln1b_ref,
                           w1_ref, b1_ref, w2_ref, b2_ref, ln2g_ref, ln2b_ref,
                           pw_ref, pb_ref, hw_ref, hb_ref,
                           out_ref):
    B, S, H = x_ref.shape
    scale = 1.0 / (HEAD_DIM ** 0.5)

    # embedding LayerNorm (flattened batch*seq rows)
    x = _layernorm(x_ref[...].reshape(B * S, H), embg_ref[...], embb_ref[...])
    bias = bias_ref[...]                       # (B, S) additive attention bias

    def layer_body(l, x2d):
        # ---- multi-head self-attention ----
        q = jnp.dot(x2d, wq_ref[l], preferred_element_type=jnp.float32) + bq_ref[l]
        k = jnp.dot(x2d, wk_ref[l], preferred_element_type=jnp.float32) + bk_ref[l]
        v = jnp.dot(x2d, wv_ref[l], preferred_element_type=jnp.float32) + bv_ref[l]
        q3 = q.reshape(B, S, H)
        k3 = k.reshape(B, S, H)
        v3 = v.reshape(B, S, H)

        ctx_heads = []
        for h in range(N_HEADS):               # static loop over heads
            sl = slice(h * HEAD_DIM, (h + 1) * HEAD_DIM)
            qh, kh, vh = q3[:, :, sl], k3[:, :, sl], v3[:, :, sl]
            # q . k^T without materializing a transpose
            s = jnp.einsum('bqd,bkd->bqk', qh, kh,
                           preferred_element_type=jnp.float32) * scale
            s = s + bias[:, None, :]
            s = s - jnp.max(s, axis=-1, keepdims=True)
            p = jnp.exp(s)
            p = p * pl.reciprocal(jnp.sum(p, axis=-1, keepdims=True), approx=True)
            ctx_heads.append(jnp.einsum('bqk,bkd->bqd', p, vh,
                                        preferred_element_type=jnp.float32))
        ctx = jnp.concatenate(ctx_heads, axis=-1).reshape(B * S, H)

        attn = jnp.dot(ctx, wo_ref[l], preferred_element_type=jnp.float32) + bo_ref[l]
        x1 = _layernorm(x2d + attn, ln1g_ref[l], ln1b_ref[l])

        # ---- FFN ----
        hdn = _gelu(jnp.dot(x1, w1_ref[l],
                            preferred_element_type=jnp.float32) + b1_ref[l])
        ffn = jnp.dot(hdn, w2_ref[l], preferred_element_type=jnp.float32) + b2_ref[l]
        return _layernorm(x1 + ffn, ln2g_ref[l], ln2b_ref[l])

    x = jax.lax.fori_loop(0, N_LAYERS, layer_body, x, unroll=True)

    # ---- pooler on the [CLS] (first) token ----
    cls = x.reshape(B, S, H)[:, 0, :]                                   # (B, H)
    pooled = jnp.tanh(jnp.dot(cls, pw_ref[...],
                              preferred_element_type=jnp.float32) + pb_ref[...])

    # ---- packed main/sub heads: one lane-dense (B, OUT_PAD) store ----
    logits = jnp.dot(pooled, hw_ref[...],
                     preferred_element_type=jnp.float32) + hb_ref[...]  # (B, OUT_PAD)
    col = jax.lax.broadcasted_iota(jnp.int32, logits.shape, 1)
    main_mask = col < NUM_MAIN
    sub_mask = jnp.logical_and(col >= NUM_MAIN, col < NUM_MAIN + NUM_SUB)

    # softmax over the main-class lanes only
    ml = jnp.where(main_mask, logits, -1e30)
    ml = ml - jnp.max(ml, axis=-1, keepdims=True)
    e = jnp.exp(ml)
    main_probs = e * pl.reciprocal(jnp.sum(e, axis=-1, keepdims=True), approx=True)

    # sigmoid over the sub-class lanes
    sub_probs = 1.0 / (1.0 + jnp.exp(-logits))

    out_ref[...] = jnp.where(main_mask, main_probs,
                             jnp.where(sub_mask, sub_probs, 0.0))


# ---------------- parameter init (deterministic, synthetic) ----------------
def init_params(key):
    def dense(k, fan_in, fan_out):
        kw, kb = jax.random.split(k)
        w = jax.random.normal(kw, (fan_in, fan_out), jnp.float32) * (fan_in ** -0.5)
        b = jax.random.normal(kb, (1, fan_out), jnp.float32) * 0.02
        return w, b

    keys = jax.random.split(key, 3 + N_LAYERS)
    params = {
        "tok_emb": jax.random.normal(keys[0], (VOCAB, HIDDEN), jnp.float32) * 0.02,
        "pos_emb": jax.random.normal(keys[1], (MAX_POS, HIDDEN), jnp.float32) * 0.02,
        "emb_ln_g": jnp.ones((1, HIDDEN), jnp.float32),
        "emb_ln_b": jnp.zeros((1, HIDDEN), jnp.float32),
    }

    names = ["wq", "bq", "wk", "bk", "wv", "bv", "wo", "bo",
             "ln1g", "ln1b", "w1", "b1", "w2", "b2", "ln2g", "ln2b"]
    per = {n: [] for n in names}
    for l in range(N_LAYERS):
        lk = jax.random.split(keys[2 + l], 6)
        wq, bq = dense(lk[0], HIDDEN, HIDDEN)
        wk, bk = dense(lk[1], HIDDEN, HIDDEN)
        wv, bv = dense(lk[2], HIDDEN, HIDDEN)
        wo, bo = dense(lk[3], HIDDEN, HIDDEN)
        w1, b1 = dense(lk[4], HIDDEN, FFN)
        w2, b2 = dense(lk[5], FFN, HIDDEN)
        vals = [wq, bq, wk, bk, wv, bv, wo, bo,
                jnp.ones((1, HIDDEN), jnp.float32), jnp.zeros((1, HIDDEN), jnp.float32),
                w1, b1, w2, b2,
                jnp.ones((1, HIDDEN), jnp.float32), jnp.zeros((1, HIDDEN), jnp.float32)]
        for n, v in zip(names, vals):
            per[n].append(v)
    # stack per-layer weights along a leading layer axis -> one DMA each, indexed
    # with fori_loop inside the fused kernel.
    params["stacked_layers"] = {n: jnp.stack(v, axis=0) for n, v in per.items()}

    hk = jax.random.split(keys[2 + N_LAYERS], 3)
    params["pooler_w"], params["pooler_b"] = dense(hk[0], HIDDEN, HIDDEN)
    params["main_w"], params["main_b"] = dense(hk[1], HIDDEN, NUM_MAIN)
    params["sub_w"], params["sub_b"] = dense(hk[2], HIDDEN, NUM_SUB)
    return params


# ---------------- full forward (RoleClassifier.forward) ----------------
def role_classifier_forward(input_ids, attention_mask, params):
    B, S = input_ids.shape
    # TODO(synk): embedding gather is data-dependent; kept in plain JAX glue.
    x = params["tok_emb"][input_ids] + params["pos_emb"][None, :S, :]

    # HF-style additive attention-mask bias: 0 for real tokens, -1e9 for padding.
    mask_bias = (1.0 - attention_mask.astype(jnp.float32)) * -1e9        # (B, S)

    # Pack main+sub head weights into one lane-dense (H, OUT_PAD) matrix so the
    # kernel emits a single unmasked full-width store.
    head_w = jnp.zeros((HIDDEN, OUT_PAD), jnp.float32)
    head_w = head_w.at[:, :NUM_MAIN].set(params["main_w"])
    head_w = head_w.at[:, NUM_MAIN:NUM_MAIN + NUM_SUB].set(params["sub_w"])
    head_b = jnp.zeros((1, OUT_PAD), jnp.float32)
    head_b = head_b.at[:, :NUM_MAIN].set(params["main_b"])
    head_b = head_b.at[:, NUM_MAIN:NUM_MAIN + NUM_SUB].set(params["sub_b"])

    st = params["stacked_layers"]
    vmem = pl.BlockSpec(memory_space=pltpu.MemorySpace.VMEM)
    n_inputs = 24

    packed = pl.pallas_call(
        role_classifier_kernel,
        out_shape=jax.ShapeDtypeStruct((B, OUT_PAD), jnp.float32),
        in_specs=[vmem] * n_inputs,
        out_specs=vmem,
    )(x, mask_bias,
      params["emb_ln_g"], params["emb_ln_b"],
      st["wq"], st["bq"], st["wk"], st["bk"], st["wv"], st["bv"],
      st["wo"], st["bo"], st["ln1g"], st["ln1b"],
      st["w1"], st["b1"], st["w2"], st["b2"], st["ln2g"], st["ln2b"],
      params["pooler_w"], params["pooler_b"], head_w, head_b)

    main_probs = packed[:, :NUM_MAIN]
    sub_probs = packed[:, NUM_MAIN:NUM_MAIN + NUM_SUB]
    return main_probs, sub_probs


if __name__ == "__main__":
    key = jax.random.PRNGKey(0)
    k_ids, k_params = jax.random.split(key)

    B, S = 2, 8
    input_ids = jax.random.randint(k_ids, (B, S), 0, VOCAB, dtype=jnp.int32)
    attention_mask = jnp.ones((B, S), dtype=jnp.int32).at[1, 6:].set(0)  # pad tail of row 1

    params = init_params(k_params)

    fwd = jax.jit(role_classifier_forward)
    main_probs, sub_probs = fwd(input_ids, attention_mask, params)
    jax.block_until_ready((main_probs, sub_probs))

    assert main_probs.shape == (B, NUM_MAIN)
    assert sub_probs.shape == (B, NUM_SUB)
    # softmax rows sum to ~1 (approx EUP reciprocal => slightly looser tol);
    # sigmoid outputs must lie strictly in (0, 1)
    assert jnp.allclose(jnp.sum(main_probs, axis=-1), 1.0, atol=1e-2)
    assert bool(jnp.all((sub_probs > 0.0) & (sub_probs < 1.0)))
    print("KERNEL_OK")
</pallas_src>

<mosaic_0001>
module attributes {stable_mosaic.version = 11 : i64} {
  func.func @role_classifier_kernel(%arg0: memref<2x8x32xf32, #tpu.memory_space<vmem>>, %arg1: memref<2x8xf32, #tpu.memory_space<vmem>>, %arg2: memref<1x32xf32, #tpu.memory_space<vmem>>, %arg3: memref<1x32xf32, #tpu.memory_space<vmem>>, %arg4: memref<2x32x32xf32, #tpu.memory_space<vmem>>, %arg5: memref<2x1x32xf32, #tpu.memory_space<vmem>>, %arg6: memref<2x32x32xf32, #tpu.memory_space<vmem>>, %arg7: memref<2x1x32xf32, #tpu.memory_space<vmem>>, %arg8: memref<2x32x32xf32, #tpu.memory_space<vmem>>, %arg9: memref<2x1x32xf32, #tpu.memory_space<vmem>>, %arg10: memref<2x32x32xf32, #tpu.memory_space<vmem>>, %arg11: memref<2x1x32xf32, #tpu.memory_space<vmem>>, %arg12: memref<2x1x32xf32, #tpu.memory_space<vmem>>, %arg13: memref<2x1x32xf32, #tpu.memory_space<vmem>>, %arg14: memref<2x32x64xf32, #tpu.memory_space<vmem>>, %arg15: memref<2x1x64xf32, #tpu.memory_space<vmem>>, %arg16: memref<2x64x32xf32, #tpu.memory_space<vmem>>, %arg17: memref<2x1x32xf32, #tpu.memory_space<vmem>>, %arg18: memref<2x1x32xf32, #tpu.memory_space<vmem>>, %arg19: memref<2x1x32xf32, #tpu.memory_space<vmem>>, %arg20: memref<32x32xf32, #tpu.memory_space<vmem>>, %arg21: memref<1x32xf32, #tpu.memory_space<vmem>>, %arg22: memref<32x128xf32, #tpu.memory_space<vmem>>, %arg23: memref<1x128xf32, #tpu.memory_space<vmem>>, %arg24: memref<2x128xf32, #tpu.memory_space<vmem>>) attributes {dimension_semantics = [], scalar_prefetch = 0 : i64, scratch_operands = 0 : i64, tpu.core_type = #tpu.core_type<tc>} {
    %c0 = arith.constant 0 : index
    %c0_0 = arith.constant 0 : index
    %c0_1 = arith.constant 0 : index
    %0 = vector.load %arg0[%c0, %c0_0, %c0_1] : memref<2x8x32xf32, #tpu.memory_space<vmem>>, vector<2x8x32xf32>
    %1 = vector.shape_cast %0 : vector<2x8x32xf32> to vector<16x32xf32>
    %c0_2 = arith.constant 0 : index
    %c0_3 = arith.constant 0 : index
    %2 = vector.load %arg2[%c0_2, %c0_3] : memref<1x32xf32, #tpu.memory_space<vmem>>, vector<1x32xf32>
    %c0_4 = arith.constant 0 : index
    %c0_5 = arith.constant 0 : index
    %3 = vector.load %arg3[%c0_4, %c0_5] : memref<1x32xf32, #tpu.memory_space<vmem>>, vector<1x32xf32>
    %cst = arith.constant dense<0.000000e+00> : vector<16xf32>
    %4 = vector.multi_reduction <add>, %1, %cst [1] : vector<16x32xf32> to vector<16xf32>
    %5 = vector.shape_cast %4 : vector<16xf32> to vector<16x1xf32>
    %cst_6 = arith.constant 3.200000e+01 : f32
    %6 = vector.broadcast %cst_6 : f32 to vector<16x1xf32>
    %7 = arith.divf %5, %6 : vector<16x1xf32>
    %8 = vector.broadcast %7 : vector<16x1xf32> to vector<16x32xf32>
    %9 = arith.subf %1, %8 : vector<16x32xf32>
    %10 = arith.mulf %9, %9 : vector<16x32xf32>
    %cst_7 = arith.constant dense<0.000000e+00> : vector<16xf32>
    %11 = vector.multi_reduction <add>, %10, %cst_7 [1] : vector<16x32xf32> to vector<16xf32>
    %12 = vector.shape_cast %11 : vector<16xf32> to vector<16x1xf32>
    %cst_8 = arith.constant 3.200000e+01 : f32
    %13 = vector.broadcast %cst_8 : f32 to vector<16x1xf32>
    %14 = arith.divf %12, %13 : vector<16x1xf32>
    %15 = vector.broadcast %7 : vector<16x1xf32> to vector<16x32xf32>
    %16 = arith.subf %1, %15 : vector<16x32xf32>
    %cst_9 = arith.constant 9.99999974E-6 : f32
    %17 = vector.broadcast %cst_9 : f32 to vector<16x1xf32>
    %18 = arith.addf %14, %17 : vector<16x1xf32>
    %19 = math.rsqrt %18 : vector<16x1xf32>
    %20 = vector.broadcast %19 : vector<16x1xf32> to vector<16x32xf32>
    %21 = arith.mulf %16, %20 : vector<16x32xf32>
    %22 = vector.broadcast %2 : vector<1x32xf32> to vector<16x32xf32>
    %23 = arith.mulf %21, %22 : vector<16x32xf32>
    %24 = vector.broadcast %3 : vector<1x32xf32> to vector<16x32xf32>
    %25 = arith.addf %23, %24 : vector<16x32xf32>
    %c0_10 = arith.constant 0 : index
    %c0_11 = arith.constant 0 : index
    %26 = vector.load %arg1[%c0_10, %c0_11] : memref<2x8xf32, #tpu.memory_space<vmem>>, vector<2x8xf32>
    %c0_i32 = arith.constant 0 : i32
    %27 = arith.index_cast %c0_i32 : i32 to index
    %c0_12 = arith.constant 0 : index
    %c0_13 = arith.constant 0 : index
    %28 = vector.load %arg4[%27, %c0_12, %c0_13] : memref<2x32x32xf32, #tpu.memory_space<vmem>>, vector<1x32x32xf32>
    %29 = vector.shape_cast %28 : vector<1x32x32xf32> to vector<32x32xf32>
    %cst_14 = arith.constant dense<0.000000e+00> : vector<16x32xf32>
    %30 = tpu.matmul %25, %29, %cst_14 {dimension_numbers = #tpu.dot_dimension_numbers<[1], [0], [0], [1], [0, 0, 1, 1], [], []>} : vector<16x32xf32>, vector<32x32xf32>, vector<16x32xf32> -> vector<16x32xf32>
    %31 = arith.index_cast %c0_i32 : i32 to index
    %c0_15 = arith.constant 0 : index
    %c0_16 = arith.constant 0 : index
    %32 = vector.load %arg5[%31, %c0_15, %c0_16] : memref<2x1x32xf32, #tpu.memory_space<vmem>>, vector<1x1x32xf32>
    %33 = vector.shape_cast %32 : vector<1x1x32xf32> to vector<1x32xf32>
    %34 = vector.broadcast %33 : vector<1x32xf32> to vector<16x32xf32>
    %35 = arith.addf %30, %34 : vector<16x32xf32>
    %36 = arith.index_cast %c0_i32 : i32 to index
    %c0_17 = arith.constant 0 : index
    %c0_18 = arith.constant 0 : index
    %37 = vector.load %arg6[%36, %c0_17, %c0_18] : memref<2x32x32xf32, #tpu.memory_space<vmem>>, vector<1x32x32xf32>
    %38 = vector.shape_cast %37 : vector<1x32x32xf32> to vector<32x32xf32>
    %cst_19 = arith.constant dense<0.000000e+00> : vector<16x32xf32>
    %39 = tpu.matmul %25, %38, %cst_19 {dimension_numbers = #tpu.dot_dimension_numbers<[1], [0], [0], [1], [0, 0, 1, 1], [], []>} : vector<16x32xf32>, vector<32x32xf32>, vector<16x32xf32> -> vector<16x32xf32>
    %40 = arith.index_cast %c0_i32 : i32 to index
    %c0_20 = arith.constant 0 : index
    %c0_21 = arith.constant 0 : index
    %41 = vector.load %arg7[%40, %c0_20, %c0_21] : memref<2x1x32xf32, #tpu.memory_space<vmem>>, vector<1x1x32xf32>
    %42 = vector.shape_cast %41 : vector<1x1x32xf32> to vector<1x32xf32>
    %43 = vector.broadcast %42 : vector<1x32xf32> to vector<16x32xf32>
    %44 = arith.addf %39, %43 : vector<16x32xf32>
    %45 = arith.index_cast %c0_i32 : i32 to index
    %c0_22 = arith.constant 0 : index
    %c0_23 = arith.constant 0 : index
    %46 = vector.load %arg8[%45, %c0_22, %c0_23] : memref<2x32x32xf32, #tpu.memory_space<vmem>>, vector<1x32x32xf32>
    %47 = vector.shape_cast %46 : vector<1x32x32xf32> to vector<32x32xf32>
    %cst_24 = arith.constant dense<0.000000e+00> : vector<16x32xf32>
    %48 = tpu.matmul %25, %47, %cst_24 {dimension_numbers = #tpu.dot_dimension_numbers<[1], [0], [0], [1], [0, 0, 1, 1], [], []>} : vector<16x32xf32>, vector<32x32xf32>, vector<16x32xf32> -> vector<16x32xf32>
    %49 = arith.index_cast %c0_i32 : i32 to index
    %c0_25 = arith.constant 0 : index
    %c0_26 = arith.constant 0 : index
    %50 = vector.load %arg9[%49, %c0_25, %c0_26] : memref<2x1x32xf32, #tpu.memory_space<vmem>>, vector<1x1x32xf32>
    %51 = vector.shape_cast %50 : vector<1x1x32xf32> to vector<1x32xf32>
    %52 = vector.broadcast %51 : vector<1x32xf32> to vector<16x32xf32>
    %53 = arith.addf %48, %52 : vector<16x32xf32>
    %54 = vector.shape_cast %35 : vector<16x32xf32> to vector<2x8x32xf32>
    %55 = vector.shape_cast %44 : vector<16x32xf32> to vector<2x8x32xf32>
    %56 = vector.shape_cast %53 : vector<16x32xf32> to vector<2x8x32xf32>
    %57 = vector.extract_strided_slice %54 {offsets = [0, 0, 0], sizes = [2, 8, 16], strides = [1, 1, 1]} : vector<2x8x32xf32> to vector<2x8x16xf32>
    %58 = vector.extract_strided_slice %55 {offsets = [0, 0, 0], sizes = [2, 8, 16], strides = [1, 1, 1]} : vector<2x8x32xf32> to vector<2x8x16xf32>
    %59 = vector.extract_strided_slice %56 {offsets = [0, 0, 0], sizes = [2, 8, 16], strides = [1, 1, 1]} : vector<2x8x32xf32> to vector<2x8x16xf32>
    "tpu.trace_start"() <{level = 10 : i32, message = "bqd,bkd->bqk"}> : () -> ()
    %cst_27 = arith.constant dense<0.000000e+00> : vector<2x8x8xf32>
    %60 = tpu.matmul %57, %58, %cst_27 {dimension_numbers = #tpu.dot_dimension_numbers<[2], [2], [1], [1], [0, 0, 0, 1, 1, 1], [0], [0]>} : vector<2x8x16xf32>, vector<2x8x16xf32>, vector<2x8x8xf32> -> vector<2x8x8xf32>
    "tpu.trace_stop"() : () -> ()
    %cst_28 = arith.constant 2.500000e-01 : f32
    %61 = vector.broadcast %cst_28 : f32 to vector<2x8x8xf32>
    %62 = arith.mulf %60, %61 : vector<2x8x8xf32>
    %63 = vector.shape_cast %26 : vector<2x8xf32> to vector<2x1x8xf32>
    %64 = vector.broadcast %63 : vector<2x1x8xf32> to vector<2x8x8xf32>
    %65 = arith.addf %62, %64 : vector<2x8x8xf32>
    %cst_29 = arith.constant dense<0xFF800000> : vector<2x8xf32>
    %66 = vector.multi_reduction <maximumf>, %65, %cst_29 [2] : vector<2x8x8xf32> to vector<2x8xf32>
    %67 = vector.shape_cast %66 : vector<2x8xf32> to vector<2x8x1xf32>
    %68 = vector.broadcast %67 : vector<2x8x1xf32> to vector<2x8x8xf32>
    %69 = arith.subf %65, %68 : vector<2x8x8xf32>
    %70 = math.exp %69 : vector<2x8x8xf32>
    %cst_30 = arith.constant dense<0.000000e+00> : vector<2x8xf32>
    %71 = vector.multi_reduction <add>, %70, %cst_30 [2] : vector<2x8x8xf32> to vector<2x8xf32>
    %72 = vector.shape_cast %71 : vector<2x8xf32> to vector<2x8x1xf32>
    %73 = tpu.reciprocal %72 {approx = true} : vector<2x8x1xf32> -> vector<2x8x1xf32>
    %74 = vector.broadcast %73 : vector<2x8x1xf32> to vector<2x8x8xf32>
    %75 = arith.mulf %70, %74 : vector<2x8x8xf32>
    "tpu.trace_start"() <{level = 10 : i32, message = "bqk,bkd->bqd"}> : () -> ()
    %cst_31 = arith.constant dense<0.000000e+00> : vector<2x8x16xf32>
    %76 = tpu.matmul %75, %59, %cst_31 {dimension_numbers = #tpu.dot_dimension_numbers<[2], [1], [1], [2], [0, 0, 0, 1, 1, 2], [0], [0]>} : vector<2x8x8xf32>, vector<2x8x16xf32>, vector<2x8x16xf32> -> vector<2x8x16xf32>
    "tpu.trace_stop"() : () -> ()
    %77 = vector.extract_strided_slice %54 {offsets = [0, 0, 16], sizes = [2, 8, 16], strides = [1, 1, 1]} : vector<2x8x32xf32> to vector<2x8x16xf32>
    %78 = vector.extract_strided_slice %55 {offsets = [0, 0, 16], sizes = [2, 8, 16], strides = [1, 1, 1]} : vector<2x8x32xf32> to vector<2x8x16xf32>
    %79 = vector.extract_strided_slice %56 {offsets = [0, 0, 16], sizes = [2, 8, 16], strides = [1, 1, 1]} : vector<2x8x32xf32> to vector<2x8x16xf32>
    "tpu.trace_start"() <{level = 10 : i32, message = "bqd,bkd->bqk"}> : () -> ()
    %cst_32 = arith.constant dense<0.000000e+00> : vector<2x8x8xf32>
    %80 = tpu.matmul %77, %78, %cst_32 {dimension_numbers = #tpu.dot_dimension_numbers<[2], [2], [1], [1], [0, 0, 0, 1, 1, 1], [0], [0]>} : vector<2x8x16xf32>, vector<2x8x16xf32>, vector<2x8x8xf32> -> vector<2x8x8xf32>
    "tpu.trace_stop"() : () -> ()
    %cst_33 = arith.constant 2.500000e-01 : f32
    %81 = vector.broadcast %cst_33 : f32 to vector<2x8x8xf32>
    %82 = arith.mulf %80, %81 : vector<2x8x8xf32>
    %83 = vector.shape_cast %26 : vector<2x8xf32> to vector<2x1x8xf32>
    %84 = vector.broadcast %83 : vector<2x1x8xf32> to vector<2x8x8xf32>
    %85 = arith.addf %82, %84 : vector<2x8x8xf32>
    %cst_34 = arith.constant dense<0xFF800000> : vector<2x8xf32>
    %86 = vector.multi_reduction <maximumf>, %85, %cst_34 [2] : vector<2x8x8xf32> to vector<2x8xf32>
    %87 = vector.shape_cast %86 : vector<2x8xf32> to vector<2x8x1xf32>
    %88 = vector.broadcast %87 : vector<2x8x1xf32> to vector<2x8x8xf32>
    %89 = arith.subf %85, %88 : vector<2x8x8xf32>
    %90 = math.exp %89 : vector<2x8x8xf32>
    %cst_35 = arith.constant dense<0.000000e+00> : vector<2x8xf32>
    %91 = vector.multi_reduction <add>, %90, %cst_35 [2] : vector<2x8x8xf32> to vector<2x8xf32>
    %92 = vector.shape_cast %91 : vector<2x8xf32> to vector<2x8x1xf32>
    %93 = tpu.reciprocal %92 {approx = true} : vector<2x8x1xf32> -> vector<2x8x1xf32>
    %94 = vector.broadcast %93 : vector<2x8x1xf32> to vector<2x8x8xf32>
    %95 = arith.mulf %90, %94 : vector<2x8x8xf32>
    "tpu.trace_start"() <{level = 10 : i32, message = "bqk,bkd->bqd"}> : () -> ()
    %cst_36 = arith.constant dense<0.000000e+00> : vector<2x8x16xf32>
    %96 = tpu.matmul %95, %79, %cst_36 {dimension_numbers = #tpu.dot_dimension_numbers<[2], [1], [1], [2], [0, 0, 0, 1, 1, 2], [0], [0]>} : vector<2x8x8xf32>, vector<2x8x16xf32>, vector<2x8x16xf32> -> vector<2x8x16xf32>
    "tpu.trace_stop"() : () -> ()
    %97 = tpu.concatenate %76, %96 in 2 : vector<2x8x16xf32>, vector<2x8x16xf32> -> vector<2x8x32xf32>
    %98 = vector.shape_cast %97 : vector<2x8x32xf32> to vector<16x32xf32>
    %99 = arith.index_cast %c0_i32 : i32 to index
    %c0_37 = arith.constant 0 : index
    %c0_38 = arith.constant 0 : index
    %100 = vector.load %arg10[%99, %c0_37, %c0_38] : memref<2x32x32xf32, #tpu.memory_space<vmem>>, vector<1x32x32xf32>
    %101 = vector.shape_cast %100 : vector<1x32x32xf32> to vector<32x32xf32>
    %cst_39 = arith.constant dense<0.000000e+00> : vector<16x32xf32>
    %102 = tpu.matmul %98, %101, %cst_39 {dimension_numbers = #tpu.dot_dimension_numbers<[1], [0], [0], [1], [0, 0, 1, 1], [], []>} : vector<16x32xf32>, vector<32x32xf32>, vector<16x32xf32> -> vector<16x32xf32>
    %103 = arith.index_cast %c0_i32 : i32 to index
    %c0_40 = arith.constant 0 : index
    %c0_41 = arith.constant 0 : index
    %104 = vector.load %arg11[%103, %c0_40, %c0_41] : memref<2x1x32xf32, #tpu.memory_space<vmem>>, vector<1x1x32xf32>
    %105 = vector.shape_cast %104 : vector<1x1x32xf32> to vector<1x32xf32>
    %106 = vector.broadcast %105 : vector<1x32xf32> to vector<16x32xf32>
    %107 = arith.addf %102, %106 : vector<16x32xf32>
    %108 = arith.addf %25, %107 : vector<16x32xf32>
    %109 = arith.index_cast %c0_i32 : i32 to index
    %c0_42 = arith.constant 0 : index
    %c0_43 = arith.constant 0 : index
    %110 = vector.load %arg12[%109, %c0_42, %c0_43] : memref<2x1x32xf32, #tpu.memory_space<vmem>>, vector<1x1x32xf32>
    %111 = vector.shape_cast %110 : vector<1x1x32xf32> to vector<1x32xf32>
    %112 = arith.index_cast %c0_i32 : i32 to index
    %c0_44 = arith.constant 0 : index
    %c0_45 = arith.constant 0 : index
    %113 = vector.load %arg13[%112, %c0_44, %c0_45] : memref<2x1x32xf32, #tpu.memory_space<vmem>>, vector<1x1x32xf32>
    %114 = vector.shape_cast %113 : vector<1x1x32xf32> to vector<1x32xf32>
    %cst_46 = arith.constant dense<0.000000e+00> : vector<16xf32>
    %115 = vector.multi_reduction <add>, %108, %cst_46 [1] : vector<16x32xf32> to vector<16xf32>
    %116 = vector.shape_cast %115 : vector<16xf32> to vector<16x1xf32>
    %cst_47 = arith.constant 3.200000e+01 : f32
    %117 = vector.broadcast %cst_47 : f32 to vector<16x1xf32>
    %118 = arith.divf %116, %117 : vector<16x1xf32>
    %119 = vector.broadcast %118 : vector<16x1xf32> to vector<16x32xf32>
    %120 = arith.subf %108, %119 : vector<16x32xf32>
    %121 = arith.mulf %120, %120 : vector<16x32xf32>
    %cst_48 = arith.constant dense<0.000000e+00> : vector<16xf32>
    %122 = vector.multi_reduction <add>, %121, %cst_48 [1] : vector<16x32xf32> to vector<16xf32>
    %123 = vector.shape_cast %122 : vector<16xf32> to vector<16x1xf32>
    %cst_49 = arith.constant 3.200000e+01 : f32
    %124 = vector.broadcast %cst_49 : f32 to vector<16x1xf32>
    %125 = arith.divf %123, %124 : vector<16x1xf32>
    %126 = vector.broadcast %118 : vector<16x1xf32> to vector<16x32xf32>
    %127 = arith.subf %108, %126 : vector<16x32xf32>
    %cst_50 = arith.constant 9.99999974E-6 : f32
    %128 = vector.broadcast %cst_50 : f32 to vector<16x1xf32>
    %129 = arith.addf %125, %128 : vector<16x1xf32>
    %130 = math.rsqrt %129 : vector<16x1xf32>
    %131 = vector.broadcast %130 : vector<16x1xf32> to vector<16x32xf32>
    %132 = arith.mulf %127, %131 : vector<16x32xf32>
    %133 = vector.broadcast %111 : vector<1x32xf32> to vector<16x32xf32>
    %134 = arith.mulf %132, %133 : vector<16x32xf32>
    %135 = vector.broadcast %114 : vector<1x32xf32> to vector<16x32xf32>
    %136 = arith.addf %134, %135 : vector<16x32xf32>
    %137 = arith.index_cast %c0_i32 : i32 to index
    %c0_51 = arith.constant 0 : index
    %c0_52 = arith.constant 0 : index
    %138 = vector.load %arg14[%137, %c0_51, %c0_52] : memref<2x32x64xf32, #tpu.memory_space<vmem>>, vector<1x32x64xf32>
    %139 = vector.shape_cast %138 : vector<1x32x64xf32> to vector<32x64xf32>
    %cst_53 = arith.constant dense<0.000000e+00> : vector<16x64xf32>
    %140 = tpu.matmul %136, %139, %cst_53 {dimension_numbers = #tpu.dot_dimension_numbers<[1], [0], [0], [1], [0, 0, 1, 1], [], []>} : vector<16x32xf32>, vector<32x64xf32>, vector<16x64xf32> -> vector<16x64xf32>
    %141 = arith.index_cast %c0_i32 : i32 to index
    %c0_54 = arith.constant 0 : index
    %c0_55 = arith.constant 0 : index
    %142 = vector.load %arg15[%141, %c0_54, %c0_55] : memref<2x1x64xf32, #tpu.memory_space<vmem>>, vector<1x1x64xf32>
    %143 = vector.shape_cast %142 : vector<1x1x64xf32> to vector<1x64xf32>
    %144 = vector.broadcast %143 : vector<1x64xf32> to vector<16x64xf32>
    %145 = arith.addf %140, %144 : vector<16x64xf32>
    %cst_56 = arith.constant 5.000000e-01 : f32
    %146 = vector.broadcast %cst_56 : f32 to vector<16x64xf32>
    %147 = arith.mulf %146, %145 : vector<16x64xf32>
    %cst_57 = arith.constant 4.471500e-02 : f32
    %148 = vector.broadcast %cst_57 : f32 to vector<16x64xf32>
    %149 = arith.mulf %148, %145 : vector<16x64xf32>
    %150 = arith.mulf %149, %145 : vector<16x64xf32>
    %151 = arith.mulf %150, %145 : vector<16x64xf32>
    %152 = arith.addf %145, %151 : vector<16x64xf32>
    %cst_58 = arith.constant 0.797884583 : f32
    %153 = vector.broadcast %cst_58 : f32 to vector<16x64xf32>
    %154 = arith.mulf %153, %152 : vector<16x64xf32>
    %155 = math.tanh %154 : vector<16x64xf32>
    %cst_59 = arith.constant 1.000000e+00 : f32
    %156 = vector.broadcast %cst_59 : f32 to vector<16x64xf32>
    %157 = arith.addf %156, %155 : vector<16x64xf32>
    %158 = arith.mulf %147, %157 : vector<16x64xf32>
    %159 = arith.index_cast %c0_i32 : i32 to index
    %c0_60 = arith.constant 0 : index
    %c0_61 = arith.constant 0 : index
    %160 = vector.load %arg16[%159, %c0_60, %c0_61] : memref<2x64x32xf32, #tpu.memory_space<vmem>>, vector<1x64x32xf32>
    %161 = vector.shape_cast %160 : vector<1x64x32xf32> to vector<64x32xf32>
    %cst_62 = arith.constant dense<0.000000e+00> : vector<16x32xf32>
    %162 = tpu.matmul %158, %161, %cst_62 {dimension_numbers = #tpu.dot_dimension_numbers<[1], [0], [0], [1], [0, 0, 1, 1], [], []>} : vector<16x64xf32>, vector<64x32xf32>, vector<16x32xf32> -> vector<16x32xf32>
    %163 = arith.index_cast %c0_i32 : i32 to index
    %c0_63 = arith.constant 0 : index
    %c0_64 = arith.constant 0 : index
    %164 = vector.load %arg17[%163, %c0_63, %c0_64] : memref<2x1x32xf32, #tpu.memory_space<vmem>>, vector<1x1x32xf32>
    %165 = vector.shape_cast %164 : vector<1x1x32xf32> to vector<1x32xf32>
    %166 = vector.broadcast %165 : vector<1x32xf32> to vector<16x32xf32>
    %167 = arith.addf %162, %166 : vector<16x32xf32>
    %168 = arith.addf %136, %167 : vector<16x32xf32>
    %169 = arith.index_cast %c0_i32 : i32 to index
    %c0_65 = arith.constant 0 : index
    %c0_66 = arith.constant 0 : index
    %170 = vector.load %arg18[%169, %c0_65, %c0_66] : memref<2x1x32xf32, #tpu.memory_space<vmem>>, vector<1x1x32xf32>
    %171 = vector.shape_cast %170 : vector<1x1x32xf32> to vector<1x32xf32>
    %172 = arith.index_cast %c0_i32 : i32 to index
    %c0_67 = arith.constant 0 : index
    %c0_68 = arith.constant 0 : index
    %173 = vector.load %arg19[%172, %c0_67, %c0_68] : memref<2x1x32xf32, #tpu.memory_space<vmem>>, vector<1x1x32xf32>
    %174 = vector.shape_cast %173 : vector<1x1x32xf32> to vector<1x32xf32>
    %cst_69 = arith.constant dense<0.000000e+00> : vector<16xf32>
    %175 = vector.multi_reduction <add>, %168, %cst_69 [1] : vector<16x32xf32> to vector<16xf32>
    %176 = vector.shape_cast %175 : vector<16xf32> to vector<16x1xf32>
    %cst_70 = arith.constant 3.200000e+01 : f32
    %177 = vector.broadcast %cst_70 : f32 to vector<16x1xf32>
    %178 = arith.divf %176, %177 : vector<16x1xf32>
    %179 = vector.broadcast %178 : vector<16x1xf32> to vector<16x32xf32>
    %180 = arith.subf %168, %179 : vector<16x32xf32>
    %181 = arith.mulf %180, %180 : vector<16x32xf32>
    %cst_71 = arith.constant dense<0.000000e+00> : vector<16xf32>
    %182 = vector.multi_reduction <add>, %181, %cst_71 [1] : vector<16x32xf32> to vector<16xf32>
    %183 = vector.shape_cast %182 : vector<16xf32> to vector<16x1xf32>
    %cst_72 = arith.constant 3.200000e+01 : f32
    %184 = vector.broadcast %cst_72 : f32 to vector<16x1xf32>
    %185 = arith.divf %183, %184 : vector<16x1xf32>
    %186 = vector.broadcast %178 : vector<16x1xf32> to vector<16x32xf32>
    %187 = arith.subf %168, %186 : vector<16x32xf32>
    %cst_73 = arith.constant 9.99999974E-6 : f32
    %188 = vector.broadcast %cst_73 : f32 to vector<16x1xf32>
    %189 = arith.addf %185, %188 : vector<16x1xf32>
    %190 = math.rsqrt %189 : vector<16x1xf32>
    %191 = vector.broadcast %190 : vector<16x1xf32> to vector<16x32xf32>
    %192 = arith.mulf %187, %191 : vector<16x32xf32>
    %193 = vector.broadcast %171 : vector<1x32xf32> to vector<16x32xf32>
    %194 = arith.mulf %192, %193 : vector<16x32xf32>
    %195 = vector.broadcast %174 : vector<1x32xf32> to vector<16x32xf32>
    %196 = arith.addf %194, %195 : vector<16x32xf32>
    %c1_i32 = arith.constant 1 : i32
    %197 = arith.index_cast %c1_i32 : i32 to index
    %c0_74 = arith.constant 0 : index
    %c0_75 = arith.constant 0 : index
    %198 = vector.load %arg4[%197, %c0_74, %c0_75] : memref<2x32x32xf32, #tpu.memory_space<vmem>>, vector<1x32x32xf32>
    %199 = vector.shape_cast %198 : vector<1x32x32xf32> to vector<32x32xf32>
    %cst_76 = arith.constant dense<0.000000e+00> : vector<16x32xf32>
    %200 = tpu.matmul %196, %199, %cst_76 {dimension_numbers = #tpu.dot_dimension_numbers<[1], [0], [0], [1], [0, 0, 1, 1], [], []>} : vector<16x32xf32>, vector<32x32xf32>, vector<16x32xf32> -> vector<16x32xf32>
    %201 = arith.index_cast %c1_i32 : i32 to index
    %c0_77 = arith.constant 0 : index
    %c0_78 = arith.constant 0 : index
    %202 = vector.load %arg5[%201, %c0_77, %c0_78] : memref<2x1x32xf32, #tpu.memory_space<vmem>>, vector<1x1x32xf32>
    %203 = vector.shape_cast %202 : vector<1x1x32xf32> to vector<1x32xf32>
    %204 = vector.broadcast %203 : vector<1x32xf32> to vector<16x32xf32>
    %205 = arith.addf %200, %204 : vector<16x32xf32>
    %206 = arith.index_cast %c1_i32 : i32 to index
    %c0_79 = arith.constant 0 : index
    %c0_80 = arith.constant 0 : index
    %207 = vector.load %arg6[%206, %c0_79, %c0_80] : memref<2x32x32xf32, #tpu.memory_space<vmem>>, vector<1x32x32xf32>
    %208 = vector.shape_cast %207 : vector<1x32x32xf32> to vector<32x32xf32>
    %cst_81 = arith.constant dense<0.000000e+00> : vector<16x32xf32>
    %209 = tpu.matmul %196, %208, %cst_81 {dimension_numbers = #tpu.dot_dimension_numbers<[1], [0], [0], [1], [0, 0, 1, 1], [], []>} : vector<16x32xf32>, vector<32x32xf32>, vector<16x32xf32> -> vector<16x32xf32>
    %210 = arith.index_cast %c1_i32 : i32 to index
    %c0_82 = arith.constant 0 : index
    %c0_83 = arith.constant 0 : index
    %211 = vector.load %arg7[%210, %c0_82, %c0_83] : memref<2x1x32xf32, #tpu.memory_space<vmem>>, vector<1x1x32xf32>
    %212 = vector.shape_cast %211 : vector<1x1x32xf32> to vector<1x32xf32>
    %213 = vector.broadcast %212 : vector<1x32xf32> to vector<16x32xf32>
    %214 = arith.addf %209, %213 : vector<16x32xf32>
    %215 = arith.index_cast %c1_i32 : i32 to index
    %c0_84 = arith.constant 0 : index
    %c0_85 = arith.constant 0 : index
    %216 = vector.load %arg8[%215, %c0_84, %c0_85] : memref<2x32x32xf32, #tpu.memory_space<vmem>>, vector<1x32x32xf32>
    %217 = vector.shape_cast %216 : vector<1x32x32xf32> to vector<32x32xf32>
    %cst_86 = arith.constant dense<0.000000e+00> : vector<16x32xf32>
    %218 = tpu.matmul %196, %217, %cst_86 {dimension_numbers = #tpu.dot_dimension_numbers<[1], [0], [0], [1], [0, 0, 1, 1], [], []>} : vector<16x32xf32>, vector<32x32xf32>, vector<16x32xf32> -> vector<16x32xf32>
    %219 = arith.index_cast %c1_i32 : i32 to index
    %c0_87 = arith.constant 0 : index
    %c0_88 = arith.constant 0 : index
    %220 = vector.load %arg9[%219, %c0_87, %c0_88] : memref<2x1x32xf32, #tpu.memory_space<vmem>>, vector<1x1x32xf32>
    %221 = vector.shape_cast %220 : vector<1x1x32xf32> to vector<1x32xf32>
    %222 = vector.broadcast %221 : vector<1x32xf32> to vector<16x32xf32>
    %223 = arith.addf %218, %222 : vector<16x32xf32>
    %224 = vector.shape_cast %205 : vector<16x32xf32> to vector<2x8x32xf32>
    %225 = vector.shape_cast %214 : vector<16x32xf32> to vector<2x8x32xf32>
    %226 = vector.shape_cast %223 : vector<16x32xf32> to vector<2x8x32xf32>
    %227 = vector.extract_strided_slice %224 {offsets = [0, 0, 0], sizes = [2, 8, 16], strides = [1, 1, 1]} : vector<2x8x32xf32> to vector<2x8x16xf32>
    %228 = vector.extract_strided_slice %225 {offsets = [0, 0, 0], sizes = [2, 8, 16], strides = [1, 1, 1]} : vector<2x8x32xf32> to vector<2x8x16xf32>
    %229 = vector.extract_strided_slice %226 {offsets = [0, 0, 0], sizes = [2, 8, 16], strides = [1, 1, 1]} : vector<2x8x32xf32> to vector<2x8x16xf32>
    "tpu.trace_start"() <{level = 10 : i32, message = "bqd,bkd->bqk"}> : () -> ()
    %cst_89 = arith.constant dense<0.000000e+00> : vector<2x8x8xf32>
    %230 = tpu.matmul %227, %228, %cst_89 {dimension_numbers = #tpu.dot_dimension_numbers<[2], [2], [1], [1], [0, 0, 0, 1, 1, 1], [0], [0]>} : vector<2x8x16xf32>, vector<2x8x16xf32>, vector<2x8x8xf32> -> vector<2x8x8xf32>
    "tpu.trace_stop"() : () -> ()
    %cst_90 = arith.constant 2.500000e-01 : f32
    %231 = vector.broadcast %cst_90 : f32 to vector<2x8x8xf32>
    %232 = arith.mulf %230, %231 : vector<2x8x8xf32>
    %233 = vector.shape_cast %26 : vector<2x8xf32> to vector<2x1x8xf32>
    %234 = vector.broadcast %233 : vector<2x1x8xf32> to vector<2x8x8xf32>
    %235 = arith.addf %232, %234 : vector<2x8x8xf32>
    %cst_91 = arith.constant dense<0xFF800000> : vector<2x8xf32>
    %236 = vector.multi_reduction <maximumf>, %235, %cst_91 [2] : vector<2x8x8xf32> to vector<2x8xf32>
    %237 = vector.shape_cast %236 : vector<2x8xf32> to vector<2x8x1xf32>
    %238 = vector.broadcast %237 : vector<2x8x1xf32> to vector<2x8x8xf32>
    %239 = arith.subf %235, %238 : vector<2x8x8xf32>
    %240 = math.exp %239 : vector<2x8x8xf32>
    %cst_92 = arith.constant dense<0.000000e+00> : vector<2x8xf32>
    %241 = vector.multi_reduction <add>, %240, %cst_92 [2] : vector<2x8x8xf32> to vector<2x8xf32>
    %242 = vector.shape_cast %241 : vector<2x8xf32> to vector<2x8x1xf32>
    %243 = tpu.reciprocal %242 {approx = true} : vector<2x8x1xf32> -> vector<2x8x1xf32>
    %244 = vector.broadcast %243 : vector<2x8x1xf32> to vector<2x8x8xf32>
    %245 = arith.mulf %240, %244 : vector<2x8x8xf32>
    "tpu.trace_start"() <{level = 10 : i32, message = "bqk,bkd->bqd"}> : () -> ()
    %cst_93 = arith.constant dense<0.000000e+00> : vector<2x8x16xf32>
    %246 = tpu.matmul %245, %229, %cst_93 {dimension_numbers = #tpu.dot_dimension_numbers<[2], [1], [1], [2], [0, 0, 0, 1, 1, 2], [0], [0]>} : vector<2x8x8xf32>, vector<2x8x16xf32>, vector<2x8x16xf32> -> vector<2x8x16xf32>
    "tpu.trace_stop"() : () -> ()
    %247 = vector.extract_strided_slice %224 {offsets = [0, 0, 16], sizes = [2, 8, 16], strides = [1, 1, 1]} : vector<2x8x32xf32> to vector<2x8x16xf32>
    %248 = vector.extract_strided_slice %225 {offsets = [0, 0, 16], sizes = [2, 8, 16], strides = [1, 1, 1]} : vector<2x8x32xf32> to vector<2x8x16xf32>
    %249 = vector.extract_strided_slice %226 {offsets = [0, 0, 16], sizes = [2, 8, 16], strides = [1, 1, 1]} : vector<2x8x32xf32> to vector<2x8x16xf32>
    "tpu.trace_start"() <{level = 10 : i32, message = "bqd,bkd->bqk"}> : () -> ()
    %cst_94 = arith.constant dense<0.000000e+00> : vector<2x8x8xf32>
    %250 = tpu.matmul %247, %248, %cst_94 {dimension_numbers = #tpu.dot_dimension_numbers<[2], [2], [1], [1], [0, 0, 0, 1, 1, 1], [0], [0]>} : vector<2x8x16xf32>, vector<2x8x16xf32>, vector<2x8x8xf32> -> vector<2x8x8xf32>
    "tpu.trace_stop"() : () -> ()
    %cst_95 = arith.constant 2.500000e-01 : f32
    %251 = vector.broadcast %cst_95 : f32 to vector<2x8x8xf32>
    %252 = arith.mulf %250, %251 : vector<2x8x8xf32>
    %253 = vector.shape_cast %26 : vector<2x8xf32> to vector<2x1x8xf32>
    %254 = vector.broadcast %253 : vector<2x1x8xf32> to vector<2x8x8xf32>
    %255 = arith.addf %252, %254 : vector<2x8x8xf32>
    %cst_96 = arith.constant dense<0xFF800000> : vector<2x8xf32>
    %256 = vector.multi_reduction <maximumf>, %255, %cst_96 [2] : vector<2x8x8xf32> to vector<2x8xf32>
    %257 = vector.shape_cast %256 : vector<2x8xf32> to vector<2x8x1xf32>
    %258 = vector.broadcast %257 : vector<2x8x1xf32> to vector<2x8x8xf32>
    %259 = arith.subf %255, %258 : vector<2x8x8xf32>
    %260 = math.exp %259 : vector<2x8x8xf32>
    %cst_97 = arith.constant dense<0.000000e+00> : vector<2x8xf32>
    %261 = vector.multi_reduction <add>, %260, %cst_97 [2] : vector<2x8x8xf32> to vector<2x8xf32>
    %262 = vector.shape_cast %261 : vector<2x8xf32> to vector<2x8x1xf32>
    %263 = tpu.reciprocal %262 {approx = true} : vector<2x8x1xf32> -> vector<2x8x1xf32>
    %264 = vector.broadcast %263 : vector<2x8x1xf32> to vector<2x8x8xf32>
    %265 = arith.mulf %260, %264 : vector<2x8x8xf32>
    "tpu.trace_start"() <{level = 10 : i32, message = "bqk,bkd->bqd"}> : () -> ()
    %cst_98 = arith.constant dense<0.000000e+00> : vector<2x8x16xf32>
    %266 = tpu.matmul %265, %249, %cst_98 {dimension_numbers = #tpu.dot_dimension_numbers<[2], [1], [1], [2], [0, 0, 0, 1, 1, 2], [0], [0]>} : vector<2x8x8xf32>, vector<2x8x16xf32>, vector<2x8x16xf32> -> vector<2x8x16xf32>
    "tpu.trace_stop"() : () -> ()
    %267 = tpu.concatenate %246, %266 in 2 : vector<2x8x16xf32>, vector<2x8x16xf32> -> vector<2x8x32xf32>
    %268 = vector.shape_cast %267 : vector<2x8x32xf32> to vector<16x32xf32>
    %269 = arith.index_cast %c1_i32 : i32 to index
    %c0_99 = arith.constant 0 : index
    %c0_100 = arith.constant 0 : index
    %270 = vector.load %arg10[%269, %c0_99, %c0_100] : memref<2x32x32xf32, #tpu.memory_space<vmem>>, vector<1x32x32xf32>
    %271 = vector.shape_cast %270 : vector<1x32x32xf32> to vector<32x32xf32>
    %cst_101 = arith.constant dense<0.000000e+00> : vector<16x32xf32>
    %272 = tpu.matmul %268, %271, %cst_101 {dimension_numbers = #tpu.dot_dimension_numbers<[1], [0], [0], [1], [0, 0, 1, 1], [], []>} : vector<16x32xf32>, vector<32x32xf32>, vector<16x32xf32> -> vector<16x32xf32>
    %273 = arith.index_cast %c1_i32 : i32 to index
    %c0_102 = arith.constant 0 : index
    %c0_103 = arith.constant 0 : index
    %274 = vector.load %arg11[%273, %c0_102, %c0_103] : memref<2x1x32xf32, #tpu.memory_space<vmem>>, vector<1x1x32xf32>
    %275 = vector.shape_cast %274 : vector<1x1x32xf32> to vector<1x32xf32>
    %276 = vector.broadcast %275 : vector<1x32xf32> to vector<16x32xf32>
    %277 = arith.addf %272, %276 : vector<16x32xf32>
    %278 = arith.addf %196, %277 : vector<16x32xf32>
    %279 = arith.index_cast %c1_i32 : i32 to index
    %c0_104 = arith.constant 0 : index
    %c0_105 = arith.constant 0 : index
    %280 = vector.load %arg12[%279, %c0_104, %c0_105] : memref<2x1x32xf32, #tpu.memory_space<vmem>>, vector<1x1x32xf32>
    %281 = vector.shape_cast %280 : vector<1x1x32xf32> to vector<1x32xf32>
    %282 = arith.index_cast %c1_i32 : i32 to index
    %c0_106 = arith.constant 0 : index
    %c0_107 = arith.constant 0 : index
    %283 = vector.load %arg13[%282, %c0_106, %c0_107] : memref<2x1x32xf32, #tpu.memory_space<vmem>>, vector<1x1x32xf32>
    %284 = vector.shape_cast %283 : vector<1x1x32xf32> to vector<1x32xf32>
    %cst_108 = arith.constant dense<0.000000e+00> : vector<16xf32>
    %285 = vector.multi_reduction <add>, %278, %cst_108 [1] : vector<16x32xf32> to vector<16xf32>
    %286 = vector.shape_cast %285 : vector<16xf32> to vector<16x1xf32>
    %cst_109 = arith.constant 3.200000e+01 : f32
    %287 = vector.broadcast %cst_109 : f32 to vector<16x1xf32>
    %288 = arith.divf %286, %287 : vector<16x1xf32>
    %289 = vector.broadcast %288 : vector<16x1xf32> to vector<16x32xf32>
    %290 = arith.subf %278, %289 : vector<16x32xf32>
    %291 = arith.mulf %290, %290 : vector<16x32xf32>
    %cst_110 = arith.constant dense<0.000000e+00> : vector<16xf32>
    %292 = vector.multi_reduction <add>, %291, %cst_110 [1] : vector<16x32xf32> to vector<16xf32>
    %293 = vector.shape_cast %292 : vector<16xf32> to vector<16x1xf32>
    %cst_111 = arith.constant 3.200000e+01 : f32
    %294 = vector.broadcast %cst_111 : f32 to vector<16x1xf32>
    %295 = arith.divf %293, %294 : vector<16x1xf32>
    %296 = vector.broadcast %288 : vector<16x1xf32> to vector<16x32xf32>
    %297 = arith.subf %278, %296 : vector<16x32xf32>
    %cst_112 = arith.constant 9.99999974E-6 : f32
    %298 = vector.broadcast %cst_112 : f32 to vector<16x1xf32>
    %299 = arith.addf %295, %298 : vector<16x1xf32>
    %300 = math.rsqrt %299 : vector<16x1xf32>
    %301 = vector.broadcast %300 : vector<16x1xf32> to vector<16x32xf32>
    %302 = arith.mulf %297, %301 : vector<16x32xf32>
    %303 = vector.broadcast %281 : vector<1x32xf32> to vector<16x32xf32>
    %304 = arith.mulf %302, %303 : vector<16x32xf32>
    %305 = vector.broadcast %284 : vector<1x32xf32> to vector<16x32xf32>
    %306 = arith.addf %304, %305 : vector<16x32xf32>
    %307 = arith.index_cast %c1_i32 : i32 to index
    %c0_113 = arith.constant 0 : index
    %c0_114 = arith.constant 0 : index
    %308 = vector.load %arg14[%307, %c0_113, %c0_114] : memref<2x32x64xf32, #tpu.memory_space<vmem>>, vector<1x32x64xf32>
    %309 = vector.shape_cast %308 : vector<1x32x64xf32> to vector<32x64xf32>
    %cst_115 = arith.constant dense<0.000000e+00> : vector<16x64xf32>
    %310 = tpu.matmul %306, %309, %cst_115 {dimension_numbers = #tpu.dot_dimension_numbers<[1], [0], [0], [1], [0, 0, 1, 1], [], []>} : vector<16x32xf32>, vector<32x64xf32>, vector<16x64xf32> -> vector<16x64xf32>
    %311 = arith.index_cast %c1_i32 : i32 to index
    %c0_116 = arith.constant 0 : index
    %c0_117 = arith.constant 0 : index
    %312 = vector.load %arg15[%311, %c0_116, %c0_117] : memref<2x1x64xf32, #tpu.memory_space<vmem>>, vector<1x1x64xf32>
    %313 = vector.shape_cast %312 : vector<1x1x64xf32> to vector<1x64xf32>
    %314 = vector.broadcast %313 : vector<1x64xf32> to vector<16x64xf32>
    %315 = arith.addf %310, %314 : vector<16x64xf32>
    %cst_118 = arith.constant 5.000000e-01 : f32
    %316 = vector.broadcast %cst_118 : f32 to vector<16x64xf32>
    %317 = arith.mulf %316, %315 : vector<16x64xf32>
    %cst_119 = arith.constant 4.471500e-02 : f32
    %318 = vector.broadcast %cst_119 : f32 to vector<16x64xf32>
    %319 = arith.mulf %318, %315 : vector<16x64xf32>
    %320 = arith.mulf %319, %315 : vector<16x64xf32>
    %321 = arith.mulf %320, %315 : vector<16x64xf32>
    %322 = arith.addf %315, %321 : vector<16x64xf32>
    %cst_120 = arith.constant 0.797884583 : f32
    %323 = vector.broadcast %cst_120 : f32 to vector<16x64xf32>
    %324 = arith.mulf %323, %322 : vector<16x64xf32>
    %325 = math.tanh %324 : vector<16x64xf32>
    %cst_121 = arith.constant 1.000000e+00 : f32
    %326 = vector.broadcast %cst_121 : f32 to vector<16x64xf32>
    %327 = arith.addf %326, %325 : vector<16x64xf32>
    %328 = arith.mulf %317, %327 : vector<16x64xf32>
    %329 = arith.index_cast %c1_i32 : i32 to index
    %c0_122 = arith.constant 0 : index
    %c0_123 = arith.constant 0 : index
    %330 = vector.load %arg16[%329, %c0_122, %c0_123] : memref<2x64x32xf32, #tpu.memory_space<vmem>>, vector<1x64x32xf32>
    %331 = vector.shape_cast %330 : vector<1x64x32xf32> to vector<64x32xf32>
    %cst_124 = arith.constant dense<0.000000e+00> : vector<16x32xf32>
    %332 = tpu.matmul %328, %331, %cst_124 {dimension_numbers = #tpu.dot_dimension_numbers<[1], [0], [0], [1], [0, 0, 1, 1], [], []>} : vector<16x64xf32>, vector<64x32xf32>, vector<16x32xf32> -> vector<16x32xf32>
    %333 = arith.index_cast %c1_i32 : i32 to index
    %c0_125 = arith.constant 0 : index
    %c0_126 = arith.constant 0 : index
    %334 = vector.load %arg17[%333, %c0_125, %c0_126] : memref<2x1x32xf32, #tpu.memory_space<vmem>>, vector<1x1x32xf32>
    %335 = vector.shape_cast %334 : vector<1x1x32xf32> to vector<1x32xf32>
    %336 = vector.broadcast %335 : vector<1x32xf32> to vector<16x32xf32>
    %337 = arith.addf %332, %336 : vector<16x32xf32>
    %338 = arith.addf %306, %337 : vector<16x32xf32>
    %339 = arith.index_cast %c1_i32 : i32 to index
    %c0_127 = arith.constant 0 : index
    %c0_128 = arith.constant 0 : index
    %340 = vector.load %arg18[%339, %c0_127, %c0_128] : memref<2x1x32xf32, #tpu.memory_space<vmem>>, vector<1x1x32xf32>
    %341 = vector.shape_cast %340 : vector<1x1x32xf32> to vector<1x32xf32>
    %342 = arith.index_cast %c1_i32 : i32 to index
    %c0_129 = arith.constant 0 : index
    %c0_130 = arith.constant 0 : index
    %343 = vector.load %arg19[%342, %c0_129, %c0_130] : memref<2x1x32xf32, #tpu.memory_space<vmem>>, vector<1x1x32xf32>
    %344 = vector.shape_cast %343 : vector<1x1x32xf32> to vector<1x32xf32>
    %cst_131 = arith.constant dense<0.000000e+00> : vector<16xf32>
    %345 = vector.multi_reduction <add>, %338, %cst_131 [1] : vector<16x32xf32> to vector<16xf32>
    %346 = vector.shape_cast %345 : vector<16xf32> to vector<16x1xf32>
    %cst_132 = arith.constant 3.200000e+01 : f32
    %347 = vector.broadcast %cst_132 : f32 to vector<16x1xf32>
    %348 = arith.divf %346, %347 : vector<16x1xf32>
    %349 = vector.broadcast %348 : vector<16x1xf32> to vector<16x32xf32>
    %350 = arith.subf %338, %349 : vector<16x32xf32>
    %351 = arith.mulf %350, %350 : vector<16x32xf32>
    %cst_133 = arith.constant dense<0.000000e+00> : vector<16xf32>
    %352 = vector.multi_reduction <add>, %351, %cst_133 [1] : vector<16x32xf32> to vector<16xf32>
    %353 = vector.shape_cast %352 : vector<16xf32> to vector<16x1xf32>
    %cst_134 = arith.constant 3.200000e+01 : f32
    %354 = vector.broadcast %cst_134 : f32 to vector<16x1xf32>
    %355 = arith.divf %353, %354 : vector<16x1xf32>
    %356 = vector.broadcast %348 : vector<16x1xf32> to vector<16x32xf32>
    %357 = arith.subf %338, %356 : vector<16x32xf32>
    %cst_135 = arith.constant 9.99999974E-6 : f32
    %358 = vector.broadcast %cst_135 : f32 to vector<16x1xf32>
    %359 = arith.addf %355, %358 : vector<16x1xf32>
    %360 = math.rsqrt %359 : vector<16x1xf32>
    %361 = vector.broadcast %360 : vector<16x1xf32> to vector<16x32xf32>
    %362 = arith.mulf %357, %361 : vector<16x32xf32>
    %363 = vector.broadcast %341 : vector<1x32xf32> to vector<16x32xf32>
    %364 = arith.mulf %362, %363 : vector<16x32xf32>
    %365 = vector.broadcast %344 : vector<1x32xf32> to vector<16x32xf32>
    %366 = arith.addf %364, %365 : vector<16x32xf32>
    %c2_i32 = arith.constant 2 : i32
    %367 = vector.shape_cast %366 : vector<16x32xf32> to vector<2x8x32xf32>
    %368 = vector.extract_strided_slice %367 {offsets = [0, 0, 0], sizes = [2, 1, 32], strides = [1, 1, 1]} : vector<2x8x32xf32> to vector<2x1x32xf32>
    %369 = vector.shape_cast %368 : vector<2x1x32xf32> to vector<2x32xf32>
    %c0_136 = arith.constant 0 : index
    %c0_137 = arith.constant 0 : index
    %370 = vector.load %arg20[%c0_136, %c0_137] : memref<32x32xf32, #tpu.memory_space<vmem>>, vector<32x32xf32>
    %cst_138 = arith.constant dense<0.000000e+00> : vector<2x32xf32>
    %371 = tpu.matmul %369, %370, %cst_138 {dimension_numbers = #tpu.dot_dimension_numbers<[1], [0], [0], [1], [0, 0, 1, 1], [], []>} : vector<2x32xf32>, vector<32x32xf32>, vector<2x32xf32> -> vector<2x32xf32>
    %c0_139 = arith.constant 0 : index
    %c0_140 = arith.constant 0 : index
    %372 = vector.load %arg21[%c0_139, %c0_140] : memref<1x32xf32, #tpu.memory_space<vmem>>, vector<1x32xf32>
    %373 = vector.broadcast %372 : vector<1x32xf32> to vector<2x32xf32>
    %374 = arith.addf %371, %373 : vector<2x32xf32>
    %375 = math.tanh %374 : vector<2x32xf32>
    %c0_141 = arith.constant 0 : index
    %c0_142 = arith.constant 0 : index
    %376 = vector.load %arg22[%c0_141, %c0_142] : memref<32x128xf32, #tpu.memory_space<vmem>>, vector<32x128xf32>
    %cst_143 = arith.constant dense<0.000000e+00> : vector<2x128xf32>
    %377 = tpu.matmul %375, %376, %cst_143 {dimension_numbers = #tpu.dot_dimension_numbers<[1], [0], [0], [1], [0, 0, 1, 1], [], []>} : vector<2x32xf32>, vector<32x128xf32>, vector<2x128xf32> -> vector<2x128xf32>
    %c0_144 = arith.constant 0 : index
    %c0_145 = arith.constant 0 : index
    %378 = vector.load %arg23[%c0_144, %c0_145] : memref<1x128xf32, #tpu.memory_space<vmem>>, vector<1x128xf32>
    %379 = vector.broadcast %378 : vector<1x128xf32> to vector<2x128xf32>
    %380 = arith.addf %377, %379 : vector<2x128xf32>
    %381 = tpu.iota {dimensions = array<i32: 1>} : vector<2x128xi32>
    %c4_i32 = arith.constant 4 : i32
    %382 = vector.broadcast %c4_i32 : i32 to vector<2x128xi32>
    %383 = arith.cmpi slt, %381, %382 : vector<2x128xi32>
    %c4_i32_146 = arith.constant 4 : i32
    %384 = vector.broadcast %c4_i32_146 : i32 to vector<2x128xi32>
    %385 = arith.cmpi sge, %381, %384 : vector<2x128xi32>
    %c10_i32 = arith.constant 10 : i32
    %386 = vector.broadcast %c10_i32 : i32 to vector<2x128xi32>
    %387 = arith.cmpi slt, %381, %386 : vector<2x128xi32>
    %388 = arith.andi %385, %387 : vector<2x128xi1>
    %cst_147 = arith.constant -1.000000e+30 : f32
    %389 = vector.broadcast %cst_147 : f32 to vector<2x128xf32>
    %390 = arith.select %383, %380, %389 : vector<2x128xi1>, vector<2x128xf32>
    %cst_148 = arith.constant dense<0xFF800000> : vector<2xf32>
    %391 = vector.multi_reduction <maximumf>, %390, %cst_148 [1] : vector<2x128xf32> to vector<2xf32>
    %392 = vector.shape_cast %391 : vector<2xf32> to vector<2x1xf32>
    %393 = vector.broadcast %392 : vector<2x1xf32> to vector<2x128xf32>
    %394 = arith.subf %390, %393 : vector<2x128xf32>
    %395 = math.exp %394 : vector<2x128xf32>
    %cst_149 = arith.constant dense<0.000000e+00> : vector<2xf32>
    %396 = vector.multi_reduction <add>, %395, %cst_149 [1] : vector<2x128xf32> to vector<2xf32>
    %397 = vector.shape_cast %396 : vector<2xf32> to vector<2x1xf32>
    %398 = tpu.reciprocal %397 {approx = true} : vector<2x1xf32> -> vector<2x1xf32>
    %399 = vector.broadcast %398 : vector<2x1xf32> to vector<2x128xf32>
    %400 = arith.mulf %395, %399 : vector<2x128xf32>
    %cst_150 = arith.constant 0.000000e+00 : f32
    %401 = vector.broadcast %cst_150 : f32 to vector<2x128xf32>
    %402 = arith.subf %401, %380 : vector<2x128xf32>
    %403 = math.exp %402 : vector<2x128xf32>
    %cst_151 = arith.constant 1.000000e+00 : f32
    %404 = vector.broadcast %cst_151 : f32 to vector<2x128xf32>
    %405 = arith.addf %404, %403 : vector<2x128xf32>
    %cst_152 = arith.constant 1.000000e+00 : f32
    %406 = vector.broadcast %cst_152 : f32 to vector<2x128xf32>
    %407 = arith.divf %406, %405 : vector<2x128xf32>
    %cst_153 = arith.constant 0.000000e+00 : f32
    %408 = vector.broadcast %cst_153 : f32 to vector<2x128xf32>
    %409 = arith.select %388, %407, %408 : vector<2x128xi1>, vector<2x128xf32>
    %410 = arith.select %383, %400, %409 : vector<2x128xi1>, vector<2x128xf32>
    %c0_154 = arith.constant 0 : index
    %c0_155 = arith.constant 0 : index
    %411 = vector.load %arg24[%c0_154, %c0_155] : memref<2x128xf32, #tpu.memory_space<vmem>>, vector<2x128xf32>
    tpu.vector_store %arg24[%c0_154, %c0_155], %410 {strides = array<i32>} : memref<2x128xf32, #tpu.memory_space<vmem>>, vector<2x128xf32>,
    return
  }
}

</mosaic_0001>

<bundles_post_ra>
// kernel: role_classifier_forward.1
= control target key start
LH: loop header
LB: loop body
LE: loop exit
PB: predicated region body
PF: predicated region fallthrough
CT: control target
= control target key end

     0   :  { %vm81_vm0 = vcmask 261120   ;;  %v3716_v48 = vmov 0.0   ;;  %vm3717_vm1 = vmmov 0   ;;  %vm390_vm2 = vcmask 130048   ;;  %s4393_s30 = smov 16   ;;  %s4416_s26 = smov 16   ;;  %s4361_s0 = inlined_call_operand.vmem [shape: f32[2,8,32], index: 0, kind: input, shape index: {}]   ;;  %s4362_s4 = inlined_call_operand.vmem [shape: f32[2,32,32], index: 4, kind: input, shape index: {}]   ;;  %s4363_s6 = inlined_call_operand.vmem [shape: f32[2,32,32], index: 6, kind: input, shape index: {}]   ;;  %s4364_s8 = inlined_call_operand.vmem [shape: f32[2,32,32], index: 8, kind: input, shape index: {}]   ;;  %s4365_s2 = inlined_call_operand.vmem [shape: f32[1,32], index: 2, kind: input, shape index: {}]   ;;  %s4366_s3 = inlined_call_operand.vmem [shape: f32[1,32], index: 3, kind: input, shape index: {}]   ;;  %s4367_s7 = inlined_call_operand.vmem [shape: f32[2,1,32], index: 7, kind: input, shape index: {}]   ;;  %s4368_s5 = inlined_call_operand.vmem [shape: f32[2,1,32], index: 5, kind: input, shape index: {}]   ;;  %s4369_s9 = inlined_call_operand.vmem [shape: f32[2,1,32], index: 9, kind: input, shape index: {}]   ;;  %s4370_s1 = inlined_call_operand.vmem [shape: f32[2,8], index: 1, kind: input, shape index: {}]   ;;  %s4371_s10 = inlined_call_operand.vmem [shape: f32[2,32,32], index: 10, kind: input, shape index: {}]   ;;  %s4372_s11 = inlined_call_operand.vmem [shape: f32[2,1,32], index: 11, kind: input, shape index: {}]   ;;  %s4373_s14 = inlined_call_operand.vmem [shape: f32[2,32,64], index: 14, kind: input, shape index: {}]   ;;  %s4374_s12 = inlined_call_operand.vmem [shape: f32[2,1,32], index: 12, kind: input, shape index: {}]   ;;  %s4375_s13 = inlined_call_operand.vmem [shape: f32[2,1,32], index: 13, kind: input, shape index: {}]   ;;  %s4376_s16 = inlined_call_operand.vmem [shape: f32[2,64,32], index: 16, kind: input, shape index: {}]   ;;  %s4377_s15 = inlined_call_operand.vmem [shape: f32[2,1,64], index: 15, kind: input, shape index: {}]   ;;  %s4378_s17 = inlined_call_operand.vmem [shape: f32[2,1,32], index: 17, kind: input, shape index: {}]   ;;  %s4379_s18 = inlined_call_operand.vmem [shape: f32[2,1,32], index: 18, kind: input, shape index: {}]   ;;  %s4380_s19 = inlined_call_operand.vmem [shape: f32[2,1,32], index: 19, kind: input, shape index: {}]   ;;  %s4381_s20 = inlined_call_operand.vmem [shape: f32[32,32], index: 20, kind: input, shape index: {}]   ;;  %s4382_s22 = inlined_call_operand.vmem [shape: f32[32,128], index: 22, kind: input, shape index: {}]   ;;  %s4383_s21 = inlined_call_operand.vmem [shape: f32[1,32], index: 21, kind: input, shape index: {}]   ;;  %s4384_s23 = inlined_call_operand.vmem [shape: f32[1,128], index: 23, kind: input, shape index: {}]   ;;  %s4385_s24 = inlined_call_operand.vmem [shape: f32[2,128], index: 24, kind: output, shape index: {}]  }
   0x1   :  { %4397 = sst [smem:[#allocation2_spill]] %s4361_s0  ;;  %vm580_vm3 = vcmask 64512   ;;  %vm1358_vm4 = vcmask 523264   ;;  %vm2840_vm5 = vcmask 1041409   ;;  %vm3006_vm7 = vcmask 1041408  }
   0x2   :  { %4398 = sst [smem:[#allocation3_spill]] %s4362_s4  ;;  %s4406_s27 = sld [smem:[#allocation2_spill]] }
   0x3   :  { %4399 = sst [smem:[#allocation4_spill]] %s4363_s6  ;;  %s4407_s0 = sld [smem:[#allocation3_spill]] }
   0x4   :  { %4400 = sst [smem:[#allocation5_spill]] %s4364_s8 }
   0x5   :  { %4401 = sst [smem:[#allocation6_spill]] %s4365_s2  ;;  %s4409_s25 = sld [smem:[#allocation5_spill]] }
   0x6   :  { %4402 = sst [smem:[#allocation7_spill]] %s4366_s3 }
   0x7   :  { %4403 = sst [smem:[#allocation8_spill]] %s4367_s7  ;;  %s4411_s6 = sld [smem:[#allocation7_spill]] }
   0x8   :  { %4404 = sst [smem:[#allocation9_spill]] %s4368_s5  ;;  %v77_v0 = vld [vmem:[%s4406_s27] sm:$0xff]  ;;  %v78_v1 = vld [vmem:[%s4406_s27 + $0x8] sm:$0xff]  ;;  %s4410_s27 = sld [smem:[#allocation6_spill]] }
   0x9   :  { %4405 = sst [smem:[#allocation10_spill]] %s4369_s9  ;;  %v82_v2 = vsel %vm81_vm0, %v77_v0, 0.0  ;;  %v85_v3 = vsel %vm81_vm0, %v78_v1, 0.0  ;;  %v126_v14 = vld [vmem:[%s4407_s0] sm:$0xff]  ;;  %v127_v15 = vld [vmem:[%s4407_s0 + $0x8] sm:$0xff]  ;;  %s4408_s9 = sld [smem:[#allocation4_spill]] }
   0xa   :  { %83 = vadd.xlane.f32.xlu0 %v82_v2  ;;  %v3516_v17 = vpack.c.bf16 %v127_v15, %v126_v14  ;;  %v128_v19 = vld [vmem:[%s4407_s0 + $0x10] sm:$0xff]  ;;  %v129_v20 = vld [vmem:[%s4407_s0 + $0x18] sm:$0xff]  ;;  %s4412_s3 = sld [smem:[#allocation8_spill]]  ;;  %s4413_s28 = sld [smem:[#allocation9_spill]]  ;;  %v557_v2 = vlaneseq }
   0xb   :  { %v3520_v22 = vpack.c.bf16 %v129_v20, %v128_v19  ;;  %v304_v26 = vld [vmem:[%s4409_s25] sm:$0xff]  ;;  %v305_v27 = vld [vmem:[%s4409_s25 + $0x8] sm:$0xff]  ;;  %v306_v43 = vld [vmem:[%s4409_s25 + $0x10] sm:$0xff]  ;;  %s4414_s29 = sld [smem:[#allocation10_spill]] }
   0xc   :  { %3517 = vmatprep.subr.bf16.mxu0 %v3516_v17  ;;  %v3532_v28 = vpack.c.bf16 %v305_v27, %v304_v26  ;;  %v307_v44 = vld [vmem:[%s4409_s25 + $0x18] sm:$0xff] }
   0xd   :  { %3519 = vmatpush3.bf16.msra.mxu0 %v3516_v17  ;;  %v3032_v38 = vld [vmem:[%s4411_s6] ss:$0 sm:$0xff]  ;;  %v3536_v47 = vpack.c.bf16 %v307_v44, %v306_v43 }
   0xe   :  { %86 = vadd.xlane.f32.xlu0 %v85_v3  ;;  %3521 = vmatprep.subr.bf16.mxu0 %v3520_v22  ;;  %v3031_v36 = vld [vmem:[%s4410_s27] ss:$0 sm:$0xff] }
   0xf   :  { %v218_v16 = vld [vmem:[%s4408_s9] sm:$0xff]  ;;  %v219_v18 = vld [vmem:[%s4408_s9 + $0x8] sm:$0xff]  ;;  %v220_v23 = vld [vmem:[%s4408_s9 + $0x10] sm:$0xff] }
  0x10   :  { %v3524_v21 = vpack.c.bf16 %v219_v18, %v218_v16  ;;  %v221_v24 = vld [vmem:[%s4408_s9 + $0x18] sm:$0xff]  ;;  %v3036_v49 = vld [vmem:[%s4412_s3] ss:$0 sm:$0xff] }
  0x11   :  { %3523 = vmatpush3.bf16.msra.mxu0 %v3520_v22  ;;  %v3528_v25 = vpack.c.bf16 %v221_v24, %v220_v23  ;;  %v3033_v54 = vld [vmem:[%s4413_s28] ss:$0 sm:$0xff] }
  0x12   :  { %3525 = vmatprep.subr.bf16.mxu1 %v3524_v21  ;;  %3533 = vmatprep.subr.bf16.mxu0 %v3532_v28  ;;  %v3039_v58 = vld [vmem:[%s4414_s29] ss:$0 sm:$0xff] }
  0x13   :  { %3527 = vmatpush3.bf16.msra.mxu1 %v3524_v21 }
  0x14   :  { %3529 = vmatprep.subr.bf16.mxu1 %v3528_v25 }
  0x17   :  { %3531 = vmatpush3.bf16.msra.mxu1 %v3528_v25 }
  0x18   :  { %3299 = vmatprep.subr.mxu1 %v3716_v48 }
  0x97   :  { %v84_v4 = vpop.xlane.xlu0 %83 }
  0x98   :  { %v89_v5 = vmul.f32 0.03125, %v84_v4  ;;  %v558_v4 = vshrl.u32 %v557_v2, 7 }
  0x9a   :  { %v91_v6 = vsub.f32 %v77_v0, %v89_v5  ;;  %v3718_v0 = vmov 1966171168  }
  0x9b   :  { %v87_v7 = vpop.xlane.xlu0 %86 }
  0x9c   :  { %v90_v8 = vmul.f32 0.03125, %v87_v7  ;;  %v93_v9 = vmul.f32 %v91_v6, %v91_v6 }
  0x9e   :  { %v92_v10 = vsub.f32 %v78_v1, %v90_v8  ;;  %v95_v11 = vsel %vm81_vm0, %v93_v9, 0.0  ;;  %v555_v1 = vunpack.c.l.s4 %v3718_v0  ;;  %v570_v8 = vsub.s32 0, %v558_v4 }
  0x9f   :  { %96 = vadd.xlane.f32.xlu1 %v95_v11 }
  0xa0   :  { %v94_v12 = vmul.f32 %v92_v10, %v92_v10  ;;  %v556_v3 = vunpack.c.0.s8 %v555_v1 }
  0xa2   :  { %v98_v13 = vsel %vm81_vm0, %v94_v12, 0.0  ;;  %v559_v5 = vsub.s32 %v556_v3, %v558_v4 }
  0xa3   :  { %99 = vadd.xlane.f32.xlu1 %v98_v13 }
 0x12c   :  { %v97_v29 = vpop.xlane.xlu1 %96 }
 0x12d   :  { %v101_v30 = vmul.f32 0.03125, %v97_v29 }
 0x12f   :  { %v103_v31 = vadd.f32 1e-05, %v101_v30 }
 0x130   :  { %v100_v32 = vpop.xlane.xlu1 %99 }
 0x131   :  { %3646 = vrsqrt.f32 %v103_v31  ;;  %v102_v33 = vmul.f32 0.03125, %v100_v32 }
 0x133   :  { %v104_v34 = vadd.f32 1e-05, %v102_v33 }
 0x135   :  { %3648 = vrsqrt.f32 %v104_v34 }
 0x13b   :  { %v3647_v35 = vpop.eup %3646 }
 0x13c   :  { %v107_v37 = vmul.f32 %v3647_v35, %v91_v6  ;;  %v3046_v6 = vld.sshfl [vmem:[%s4370_s1] sm:$0x11 pattern:$0x75316420]  ;;  %s4395_s1 = smov 112  }
 0x13d   :  { %v560_v7 = vrot.slane %v3046_v6, %v559_v5  ;;  %v553_v9 = vcombine.high %v3046_v6, %v3046_v6 }
 0x13e   :  { %v115_v39 = vmul.f32 %v3031_v36, %v107_v37 }
 0x13f   :  { %v3649_v40 = vpop.eup %3648  ;;  %v567_v11 = vrot.slane %v553_v9, %v559_v5 }
 0x140   :  { %v3893_v41 = vadd.f32 %v3032_v38, %v115_v39  ;;  %v108_v42 = vmul.f32 %v3649_v40, %v92_v10  ;;  %v3955_v10 = vrot.slane %v560_v7, %v570_v8 }
 0x141   :  { %v3958_v16 = vrot.slane %v567_v11, %v570_v8 }
 0x142   :  { %3274 = vmatprep.mubr.msk.f32.mxu0 %vm81_vm0, %v3893_v41  ;;  %3285 = vmatprep.mubr.msk.f32.mxu1 %vm81_vm0, %v3893_v41  ;;  %v116_v45 = vmul.f32 %v3031_v36, %v108_v42 }
 0x144   :  { %v3905_v46 = vadd.f32 %v3032_v38, %v116_v45 }
 0x146   :  { %3275 = vmatmul.mubr.msk.f32.vlgmr.msra.gmra.mrb[0].mxu0 %vm81_vm0, %v3905_v46  ;;  %3286 = vmatmul.mubr.msk.f32.vlgmr.msra.gmra.mrb[0].mxu1 %vm81_vm0, %v3905_v46 }
 0x147   :  { %3535 = vmatpush3.bf16.msra.mxu0 %v3532_v28  ;;  %3296 = vmatprep.mubr.msk.f32.mxu0 %vm81_vm0, %v3893_v41 }
 0x148   :  { %3537 = vmatprep.subr.bf16.mxu0 %v3536_v47  ;;  %3301 = vmatprep.mubr.msk.f32.mxu1 %vm3717_vm1, %v3716_v48 }
 0x14b   :  { %3539 = vmatpush3.bf16.msra.mxu0 %v3536_v47 }
 0x14c   :  { %3309 = vmatprep.subr.mxu0 %v3716_v48 }
 0x14e   :  { %3297 = vmatmul.mubr.msk.f32.vlgmr.msra.gmra.mrb[2].mxu0 %vm81_vm0, %v3905_v46 }
 0x14f   :  { %3311 = vmatprep.mubr.msk.f32.mxu0 %vm3717_vm1, %v3716_v48 }
 0x219   :  { %v3276_v50 = vpop.f32.mrb[0].mxu0  ;;  %v3287_v51 = vpop.f32.mrb[0].mxu1 }
 0x21a   :  { %v209_v52 = vpop.f32.mrb[1].mxu0  ;;  %v295_v53 = vpop.f32.mrb[1].mxu1  ;;  %v301_v57 = vadd.f32 %v3287_v51, %v3036_v49  ;;  %v215_v60 = vadd.f32 %v3276_v50, %v3033_v54 }
 0x21b   :  { %v3927_v55 = vadd.f32 %v3036_v49, %v295_v53  ;;  %v210_v56 = vadd.f32 %v3033_v54, %v209_v52 }
 0x21d   :  { %3300 = vmatpush3.xpose.msk.msra.mxu1 %vm390_vm2, %v3927_v55 }
 0x21e   :  { %3304 = vmatprep.subr.mxu1 %v3716_v48 }
 0x220   :  { %3302 = vmatmul.mubr.msk.f32.vlgmr.msra.gmra.mrb[2].mxu1 %vm390_vm2, %v210_v56 }
 0x221   :  { %v3298_v59 = vpop.f32.mrb[2].mxu0  ;;  %3305 = vmatpush3.xpose.msk.msra.mxu1 %vm390_vm2, %v301_v57  ;;  %3306 = vmatprep.mubr.msk.f32.mxu1 %vm3717_vm1, %v3716_v48 }
 0x222   :  { %v381_v61 = vpop.f32.mrb[3].mxu0  ;;  %3314 = vmatprep.subr.mxu1 %v3716_v48  ;;  %v3940_v62 = vadd.f32 %v3298_v59, %v3039_v58 }
 0x223   :  { %v3942_v63 = vadd.f32 %v3039_v58, %v381_v61 }
 0x224   :  { %3307 = vmatmul.mubr.msk.f32.vlgmr.msra.gmra.mrb[4].mxu1 %vm390_vm2, %v215_v60 }
 0x225   :  { %3310 = vmatpush3.msra.mxu0 %v3942_v63  ;;  %3315 = vmatpush3.msra.mxu1 %v3940_v62 }
 0x226   :  { %3319 = vmatprep.subr.mxu0 %v3716_v48  ;;  %3316 = vmatprep.mubr.msk.f32.mxu1 %vm3717_vm1, %v3716_v48 }
 0x227   :  { %3324 = vmatprep.subr.mxu1 %v3716_v48 }
 0x2f3   :  { %v463_v12 = vpop.f32.mrb[2].mxu1 }
 0x2f4   :  { %v543_v13 = vmul.f32 0.25, %v463_v12  ;;  %v3303_v14 = vpop.f32.mrb[3].mxu1 }
 0x2f6   :  { %v578_v15 = vadd.f32 %v3955_v10, %v543_v13 }
 0x2f7   :  { %v539_v17 = vpop.f32.mrb[4].mxu1 }
 0x2f8   :  { %v544_v18 = vmul.f32 0.25, %v539_v17  ;;  %v3308_v19 = vpop.f32.mrb[5].mxu1  ;;  %v581_v20 = vsel %vm580_vm3, %v578_v15, -inf }
 0x2f9   :  { %582 = vmax.xlane.f32.xlu0 %v581_v20  ;;  %v1097_v20 = vld [vmem:[%s4371_s10 + $0x10] sm:$0xff] }
 0x2fa   :  { %v579_v21 = vadd.f32 %v3958_v16, %v544_v18  ;;  %v1095_v18 = vld [vmem:[%s4371_s10] sm:$0xff] }
 0x2fc   :  { %v584_v22 = vsel %vm580_vm3, %v579_v21, -inf }
 0x2fd   :  { %585 = vmax.xlane.f32.xlu1 %v584_v22 }
 0x30e   :  { %829 = vrot.lane.b32.xlu1 %v301_v57, %s4395_s1 }
 0x312   :  { %749 = vrot.lane.b32.xlu1 %v210_v56, %s4395_s1 }
 0x386   :  { %v583_v23 = vpop.xlane.xlu0 %582 }
 0x387   :  { %v587_v24 = vsub.f32 %v578_v15, %v583_v23 }
 0x389   :  { %v589_v25 = vmul.f32 1.442695, %v587_v24 }
 0x38a   :  { %v586_v26 = vpop.xlane.xlu1 %585 }
 0x38b   :  { %3650 = vpow2.f32 %v589_v25  ;;  %v588_v27 = vsub.f32 %v579_v21, %v586_v26  ;;  %v1098_v21 = vld [vmem:[%s4371_s10 + $0x18] sm:$0xff] }
 0x38c   :  { %v3544_v22 = vpack.c.bf16 %v1098_v21, %v1097_v20  ;;  %v1349_v21 = vld [vmem:[%s4376_s16 + $0x30] sm:$0xff] }
 0x38d   :  { %v591_v28 = vmul.f32 1.442695, %v588_v27 }
 0x38e   :  { %v830_v33 = vpop.permute.xlu1 %829 }
 0x38f   :  { %3652 = vpow2.f32 %v591_v28 }
 0x392   :  { %v750_v34 = vpop.permute.xlu1 %749 }
 0x395   :  { %v3651_v29 = vpop.eup %3650 }
 0x396   :  { %v593_v30 = vsel %vm580_vm3, %v3651_v29, 0.0 }
 0x397   :  { %594 = vadd.xlane.f32.xlu0 %v593_v30 }
 0x399   :  { %v3653_v31 = vpop.eup %3652 }
 0x39a   :  { %v596_v32 = vsel %vm580_vm3, %v3653_v31, 0.0 }
 0x39b   :  { %597 = vadd.xlane.f32.xlu1 %v596_v32 }
 0x3ac   :  { %827 = vrot.lane.b32.xlu1 %v215_v60, %s4395_s1 }
 0x3ad   :  { %751 = vrot.lane.b32.xlu0 %v3927_v55, %s4395_s1 }
 0x424   :  { %v595_v35 = vpop.xlane.xlu0 %594 }
 0x425   :  { %3654 = vrcp.f32 %v595_v35 }
 0x428   :  { %v598_v36 = vpop.xlane.xlu1 %597  ;;  %v752_v39 = vpop.permute.xlu0 %751 }
 0x429   :  { %3656 = vrcp.f32 %v598_v36 }
 0x42c   :  { %v828_v43 = vpop.permute.xlu1 %827 }
 0x42f   :  { %v3655_v37 = vpop.eup %3654 }
 0x430   :  { %v601_v38 = vmul.f32 %v3655_v37, %v3651_v29 }
 0x432   :  { %3312 = vmatmul.mubr.msk.f32.vlgmr.msra.gmra.mrb[4].mxu0 %vm580_vm3, %v601_v38 }
 0x433   :  { %v3657_v40 = vpop.eup %3656  ;;  %3320 = vmatpush3.xpose.msk.msra.mxu0 %vm390_vm2, %v752_v39  ;;  %3321 = vmatprep.mubr.msk.f32.mxu0 %vm3717_vm1, %v3716_v48 }
 0x434   :  { %v602_v42 = vmul.f32 %v3657_v40, %v3653_v31  ;;  %3329 = vmatprep.subr.mxu0 %v3716_v48  ;;  %v3055_v31 = vld [vmem:[%s4372_s11] ss:$0 sm:$0xff] }
 0x436   :  { %3317 = vmatmul.mubr.msk.f32.vlgmr.msra.gmra.mrb[6].mxu1 %vm580_vm3, %v602_v42  ;;  %3322 = vmatmul.mubr.msk.f32.vlgmr.msra.gmra.mrb[6].mxu0 %vm390_vm2, %v750_v34 }
 0x437   :  { %3325 = vmatpush3.xpose.msk.msra.mxu1 %vm390_vm2, %v830_v33  ;;  %3326 = vmatprep.mubr.msk.f32.mxu1 %vm3717_vm1, %v3716_v48 }
 0x438   :  { %3334 = vmatprep.subr.mxu1 %v3716_v48  ;;  %3331 = vmatprep.mubr.msk.f32.mxu0 %vm3717_vm1, %v3716_v48 }
 0x43a   :  { %3327 = vmatmul.mubr.msk.f32.vlgmr.msra.gmra.mrb[8].mxu1 %vm390_vm2, %v828_v43 }
 0x43b   :  { %3336 = vmatprep.mubr.msk.f32.mxu1 %vm3717_vm1, %v3716_v48 }
 0x505   :  { %v3986_v44 = vpop.f32.mrb[4].mxu0 }
 0x506   :  { %v3313_v45 = vpop.f32.mrb[5].mxu0 }
 0x509   :  { %v3988_v47 = vpop.f32.mrb[6].mxu1  ;;  %v823_v49 = vpop.f32.mrb[6].mxu0 }
 0x50a   :  { %v905_v50 = vmul.f32 0.25, %v823_v49  ;;  %v3318_v51 = vpop.f32.mrb[7].mxu1  ;;  %v3323_v52 = vpop.f32.mrb[7].mxu0 }
 0x50b   :  { %v1234_v52 = vld [vmem:[%s4373_s14 + $0x8] sm:$0xff] }
 0x50c   :  { %v907_v53 = vadd.f32 %v905_v50, %v3955_v10 }
 0x50d   :  { %v901_v54 = vpop.f32.mrb[8].mxu1 }
 0x50e   :  { %v906_v55 = vmul.f32 0.25, %v901_v54  ;;  %v3328_v56 = vpop.f32.mrb[9].mxu1  ;;  %v909_v57 = vsel %vm580_vm3, %v907_v53, -inf  ;;  %v1235_v54 = vld [vmem:[%s4373_s14 + $0x10] sm:$0xff] }
 0x50f   :  { %910 = vmax.xlane.f32.xlu0 %v909_v57 }
 0x510   :  { %v908_v58 = vadd.f32 %v906_v55, %v3958_v16  ;;  %v1236_v55 = vld [vmem:[%s4373_s14 + $0x18] sm:$0xff] }
 0x511   :  { %v3552_v56 = vpack.c.bf16 %v1236_v55, %v1235_v54 }
 0x512   :  { %v912_v59 = vsel %vm580_vm3, %v908_v58, -inf }
 0x513   :  { %913 = vmax.xlane.f32.xlu1 %v912_v59 }
 0x524   :  { %1009 = vrot.lane.b32.xlu1 %v3940_v62, %s4395_s1 }
 0x59c   :  { %v911_v60 = vpop.xlane.xlu0 %910 }
 0x59d   :  { %v915_v61 = vsub.f32 %v907_v53, %v911_v60 }
 0x59f   :  { %v917_v0 = vmul.f32 1.442695, %v915_v61 }
 0x5a0   :  { %v914_v1 = vpop.xlane.xlu1 %913 }
 0x5a1   :  { %3658 = vpow2.f32 %v917_v0  ;;  %v916_v3 = vsub.f32 %v908_v58, %v914_v1 }
 0x5a3   :  { %v919_v4 = vmul.f32 1.442695, %v916_v3  ;;  %v3058_v3 = vld [vmem:[%s4374_s12] ss:$0 sm:$0xff] }
 0x5a4   :  { %v1010_v5 = vpop.permute.xlu1 %1009 }
 0x5a5   :  { %3660 = vpow2.f32 %v919_v4  ;;  %3335 = vmatpush3.msra.mxu1 %v1010_v5  ;;  %v3059_v5 = vld [vmem:[%s4375_s13] ss:$0 sm:$0xff] }
 0x5ab   :  { %v3659_v6 = vpop.eup %3658 }
 0x5ac   :  { %v921_v7 = vsel %vm580_vm3, %v3659_v6, 0.0 }
 0x5ad   :  { %922 = vadd.xlane.f32.xlu0 %v921_v7 }
 0x5af   :  { %v3661_v8 = vpop.eup %3660 }
 0x5b0   :  { %v924_v9 = vsel %vm580_vm3, %v3661_v8, 0.0 }
 0x5b1   :  { %925 = vadd.xlane.f32.xlu0 %v924_v9 }
 0x5c7   :  { %932 = vrot.lane.b32.xlu0 %v3942_v63, %s4395_s1  ;;  %v1096_v63 = vld [vmem:[%s4371_s10 + $0x8] sm:$0xff] }
 0x5c8   :  { %v3540_v19 = vpack.c.bf16 %v1096_v63, %v1095_v18  ;;  %v1347_v63 = vld [vmem:[%s4376_s16 + $0x20] sm:$0xff] }
 0x63a   :  { %v923_v62 = vpop.xlane.xlu0 %922 }
 0x63b   :  { %3662 = vrcp.f32 %v923_v62 }
 0x63e   :  { %v926_v11 = vpop.xlane.xlu0 %925 }
 0x63f   :  { %3664 = vrcp.f32 %v926_v11 }
 0x642   :  { %v933_v12 = vpop.permute.xlu0 %932 }
 0x643   :  { %3330 = vmatpush3.msra.mxu0 %v933_v12  ;;  %v1343_v12 = vld [vmem:[%s4376_s16] sm:$0xff] }
 0x644   :  { %3541 = vmatprep.subr.bf16.mxu0 %v3540_v19 }
 0x645   :  { %v3663_v13 = vpop.eup %3662 }
 0x646   :  { %v929_v14 = vmul.f32 %v3663_v13, %v3659_v6  ;;  %v1344_v13 = vld [vmem:[%s4376_s16 + $0x8] sm:$0xff] }
 0x648   :  { %3332 = vmatmul.mubr.msk.f32.vlgmr.msra.gmra.mrb[8].mxu0 %vm580_vm3, %v929_v14  ;;  %v3556_v14 = vpack.c.bf16 %v1344_v13, %v1343_v12  ;;  %v3070_v12 = vld [vmem:[%s4407_s0 + $0x30] sm:$0xff]  ;;  %v3071_v13 = vld [vmem:[%s4407_s0 + $0x38] sm:$0xff] }
 0x649   :  { %v3665_v15 = vpop.eup %3664  ;;  %3543 = vmatpush3.bf16.msra.mxu0 %v3540_v19  ;;  %v1348_v19 = vld [vmem:[%s4376_s16 + $0x28] sm:$0xff] }
 0x64a   :  { %v930_v17 = vmul.f32 %v3665_v15, %v3661_v8  ;;  %3545 = vmatprep.subr.bf16.mxu0 %v3544_v22  ;;  %v1345_v15 = vld [vmem:[%s4376_s16 + $0x10] sm:$0xff]  ;;  %v3564_v20 = vpack.c.bf16 %v1348_v19, %v1347_v63  ;;  %v3076_v63 = vld [vmem:[%s4408_s9 + $0x20] sm:$0xff]  ;;  %v3077_v19 = vld [vmem:[%s4408_s9 + $0x28] sm:$0xff] }
 0x64c   :  { %3337 = vmatmul.mubr.msk.f32.vlgmr.msra.gmra.mrb[10].mxu1 %vm580_vm3, %v930_v17  ;;  %v1346_v17 = vld [vmem:[%s4376_s16 + $0x18] sm:$0xff] }
 0x64d   :  { %3547 = vmatpush3.bf16.msra.mxu0 %v3544_v22  ;;  %v3560_v18 = vpack.c.bf16 %v1346_v17, %v1345_v15  ;;  %v1350_v22 = vld [vmem:[%s4376_s16 + $0x38] sm:$0xff]  ;;  %v3576_v15 = vpack.c.bf16 %v3071_v13, %v3070_v12 }
 0x64e   :  { %3557 = vmatprep.subr.bf16.mxu0 %v3556_v14  ;;  %v3087_v17 = vld [vmem:[%s4409_s25 + $0x38] sm:$0xff] }
 0x71b   :  { %v1004_v23 = vpop.f32.mrb[8].mxu0 }
 0x71c   :  { %1087 = vrot.lane.b32.xlu1 %v1004_v23, %s4393_s30  ;;  %v3333_v24 = vpop.f32.mrb[9].mxu0  ;;  %v3568_v23 = vpack.c.bf16 %v1350_v22, %v1349_v21 }
 0x71d   :  { %v3060_v24 = vld [vmem:[%s4377_s15] ss:$0 sm:$0xff] }
 0x71f   :  { %v1081_v25 = vpop.f32.mrb[10].mxu1 }
 0x720   :  { %1089 = vrot.lane.b32.xlu1 %v1081_v25, %s4393_s30  ;;  %v3338_v26 = vpop.f32.mrb[11].mxu1 }
 0x78e   :  { %v1088_v27 = vpop.permute.xlu1 %1087 }
 0x78f   :  { %v1093_v28 = vsel %vm390_vm2, %v3986_v44, %v1088_v27 }
 0x790   :  { %3347 = vmatprep.mubr.msk.f32.mxu0 %vm81_vm0, %v1093_v28 }
 0x792   :  { %v1090_v29 = vpop.permute.xlu1 %1089 }
 0x793   :  { %v1094_v30 = vsel %vm390_vm2, %v3988_v47, %v1090_v29 }
 0x794   :  { %3348 = vmatmul.mubr.msk.f32.vlgmr.msra.gmra.mrb[10].mxu0 %vm81_vm0, %v1094_v30 }
 0x795   :  { %3559 = vmatpush3.bf16.msra.mxu0 %v3556_v14  ;;  %v3086_v14 = vld [vmem:[%s4409_s25 + $0x30] sm:$0xff] }
 0x796   :  { %3561 = vmatprep.subr.bf16.mxu0 %v3560_v18 }
 0x799   :  { %3563 = vmatpush3.bf16.msra.mxu0 %v3560_v18  ;;  %v3592_v18 = vpack.c.bf16 %v3087_v17, %v3086_v14 }
 0x79a   :  { %3565 = vmatprep.subr.bf16.mxu0 %v3564_v20 }
 0x79d   :  { %3567 = vmatpush3.bf16.msra.mxu0 %v3564_v20  ;;  %v3580_v20 = vpack.c.bf16 %v3077_v19, %v3076_v63 }
 0x79e   :  { %3569 = vmatprep.subr.bf16.mxu0 %v3568_v23 }
 0x7a1   :  { %3571 = vmatpush3.bf16.msra.mxu0 %v3568_v23 }
 0x867   :  { %v3349_v32 = vpop.f32.mrb[10].mxu0 }
 0x868   :  { %v1184_v33 = vadd.f32 %v3349_v32, %v3055_v31  ;;  %v1178_v34 = vpop.f32.mrb[11].mxu0 }
 0x869   :  { %v1179_v35 = vadd.f32 %v3055_v31, %v1178_v34 }
 0x86a   :  { %v1188_v36 = vadd.f32 %v1184_v33, %v3905_v46 }
 0x86b   :  { %v1187_v37 = vadd.f32 %v1179_v35, %v3893_v41  ;;  %v1233_v41 = vld [vmem:[%s4373_s14] sm:$0xff] }
 0x86c   :  { %v1194_v38 = vsel %vm81_vm0, %v1188_v36, 0.0  ;;  %v3548_v53 = vpack.c.bf16 %v1234_v52, %v1233_v41 }
 0x86d   :  { %1195 = vadd.xlane.f32.xlu1 %v1194_v38  ;;  %v1191_v39 = vsel %vm81_vm0, %v1187_v37, 0.0 }
 0x86e   :  { %1192 = vadd.xlane.f32.xlu0 %v1191_v39  ;;  %3549 = vmatprep.subr.bf16.mxu1 %v3548_v53 }
 0x86f   :  { %3551 = vmatpush3.bf16.msra.mxu1 %v3548_v53 }
 0x870   :  { %3553 = vmatprep.subr.bf16.mxu1 %v3552_v56 }
 0x873   :  { %3555 = vmatpush3.bf16.msra.mxu1 %v3552_v56 }
 0x8fa   :  { %v1196_v40 = vpop.xlane.xlu1 %1195 }
 0x8fb   :  { %v1198_v42 = vmul.f32 0.03125, %v1196_v40  ;;  %v1193_v43 = vpop.xlane.xlu0 %1192 }
 0x8fc   :  { %v1197_v44 = vmul.f32 0.03125, %v1193_v43 }
 0x8fd   :  { %v1200_v45 = vsub.f32 %v1188_v36, %v1198_v42 }
 0x8fe   :  { %v1199_v47 = vsub.f32 %v1187_v37, %v1197_v44 }
 0x8ff   :  { %v1202_v51 = vmul.f32 %v1200_v45, %v1200_v45 }
 0x900   :  { %v1201_v49 = vmul.f32 %v1199_v47, %v1199_v47 }
 0x901   :  { %v1206_v46 = vsel %vm81_vm0, %v1202_v51, 0.0 }
 0x902   :  { %v1203_v50 = vsel %vm81_vm0, %v1201_v49, 0.0 }
 0x903   :  { %1204 = vadd.xlane.f32.xlu0 %v1203_v50  ;;  %v3063_v50 = vld [vmem:[%s4378_s17] ss:$0 sm:$0xff] }
 0x907   :  { %1207 = vadd.xlane.f32.xlu0 %v1206_v46 }
 0x990   :  { %v1205_v57 = vpop.xlane.xlu0 %1204 }
 0x991   :  { %v1209_v58 = vmul.f32 0.03125, %v1205_v57 }
 0x993   :  { %v1211_v59 = vadd.f32 1e-05, %v1209_v58 }
 0x994   :  { %v1208_v60 = vpop.xlane.xlu0 %1207 }
 0x995   :  { %3666 = vrsqrt.f32 %v1211_v59  ;;  %v1210_v61 = vmul.f32 0.03125, %v1208_v60 }
 0x997   :  { %v1212_v0 = vadd.f32 1e-05, %v1210_v61 }
 0x999   :  { %3668 = vrsqrt.f32 %v1212_v0 }
 0x99f   :  { %v3667_v1 = vpop.eup %3666 }
 0x9a0   :  { %v1215_v4 = vmul.f32 %v3667_v1, %v1199_v47 }
 0x9a2   :  { %v1223_v6 = vmul.f32 %v3058_v3, %v1215_v4 }
 0x9a3   :  { %v3669_v7 = vpop.eup %3668 }
 0x9a4   :  { %v1216_v8 = vmul.f32 %v3669_v7, %v1200_v45  ;;  %v1231_v9 = vadd.f32 %v3059_v5, %v1223_v6  ;;  %v3068_v6 = vld [vmem:[%s4407_s0 + $0x20] sm:$0xff]  ;;  %v3069_v7 = vld [vmem:[%s4407_s0 + $0x28] sm:$0xff] }
 0x9a6   :  { %v1224_v62 = vmul.f32 %v3058_v3, %v1216_v8  ;;  %3358 = vmatprep.mubr.msk.f32.mxu1 %vm81_vm0, %v1231_v9  ;;  %v3572_v8 = vpack.c.bf16 %v3069_v7, %v3068_v6 }
 0x9a8   :  { %v1232_v11 = vadd.f32 %v3059_v5, %v1224_v62  ;;  %v3085_v62 = vld [vmem:[%s4409_s25 + $0x28] sm:$0xff]  ;;  %3573 = vmatprep.subr.bf16.mxu1 %v3572_v8 }
 0x9aa   :  { %3359 = vmatmul.mubr.msk.f32.vlgmr.msra.gmra.mrb[12].mxu1 %vm81_vm0, %v1232_v11 }
 0x9ab   :  { %3575 = vmatpush3.bf16.msra.mxu1 %v3572_v8 }
 0x9ac   :  { %3577 = vmatprep.subr.bf16.mxu1 %v3576_v15 }
 0x9af   :  { %3579 = vmatpush3.bf16.msra.mxu1 %v3576_v15 }
 0x9b0   :  { %3581 = vmatprep.subr.bf16.mxu1 %v3580_v20 }
 0xa7d   :  { %v3360_v25 = vpop.f32.mrb[12].mxu1 }
 0xa7e   :  { %v1322_v26 = vadd.f32 %v3360_v25, %v3060_v24  ;;  %v1316_v27 = vpop.f32.mrb[13].mxu1 }
 0xa7f   :  { %v1317_v28 = vadd.f32 %v3060_v24, %v1316_v27 }
 0xa80   :  { %v1328_v29 = vmul.f32 0.044715, %v1322_v26  ;;  %v1326_v45 = vmul.f32 0.5, %v1322_v26 }
 0xa81   :  { %v1327_v30 = vmul.f32 0.044715, %v1317_v28  ;;  %v1325_v43 = vmul.f32 0.5, %v1317_v28 }
 0xa82   :  { %v1330_v31 = vmul.f32 %v1328_v29, %v1322_v26 }
 0xa83   :  { %v1329_v32 = vmul.f32 %v1327_v30, %v1317_v28 }
 0xa84   :  { %v1332_v33 = vmul.f32 %v1330_v31, %v1322_v26 }
 0xa85   :  { %v1331_v34 = vmul.f32 %v1329_v32, %v1317_v28  ;;  %v3067_v32 = vld [vmem:[%s4380_s19] ss:$0 sm:$0xff] }
 0xa86   :  { %v1334_v35 = vadd.f32 %v1332_v33, %v1322_v26 }
 0xa87   :  { %v1333_v36 = vadd.f32 %v1331_v34, %v1317_v28  ;;  %v3066_v28 = vld [vmem:[%s4379_s18] ss:$0 sm:$0xff] }
 0xa88   :  { %v1336_v37 = vmul.f32 0.7978846, %v1334_v35  ;;  %v3078_v35 = vld [vmem:[%s4408_s9 + $0x30] sm:$0xff] }
 0xa89   :  { %v1335_v38 = vmul.f32 0.7978846, %v1333_v36  ;;  %v3079_v36 = vld [vmem:[%s4408_s9 + $0x38] sm:$0xff] }
 0xa8a   :  { %3670 = vtanh.f32 %v1336_v37 }
 0xa8b   :  { %3672 = vtanh.f32 %v1335_v38 }
 0xa94   :  { %v3671_v39 = vpop.eup %3670 }
 0xa95   :  { %v3673_v40 = vpop.eup %3672  ;;  %v1340_v42 = vadd.f32 1.0, %v3671_v39  ;;  %v3584_v39 = vpack.c.bf16 %v3079_v36, %v3078_v35 }
 0xa96   :  { %v1339_v44 = vadd.f32 1.0, %v3673_v40  ;;  %v3089_v40 = vld [vmem:[%s4414_s29 + $0x1] ss:$0 sm:$0xff] }
 0xa97   :  { %v1342_v49 = vmul.f32 %v1340_v42, %v1326_v45 }
 0xa98   :  { %v1341_v47 = vmul.f32 %v1339_v44, %v1325_v43 }
 0xa9a   :  { %3377 = vmatprep.mubr.msk.f32.mxu0 %vm1358_vm4, %v1341_v47 }
 0xa9b   :  { %3378 = vmatmul.mubr.msk.f32.vlgmr.msra.gmra.mrb[12].mxu0 %vm1358_vm4, %v1342_v49  ;;  %v3081_v49 = vld [vmem:[%s4412_s3 + $0x1] ss:$0 sm:$0xff]  ;;  %s4415_s3 = smov 112  }
 0xb6e   :  { %v3379_v51 = vpop.f32.mrb[12].mxu0 }
 0xb6f   :  { %v1437_v46 = vadd.f32 %v3379_v51, %v3063_v50  ;;  %v1431_v41 = vpop.f32.mrb[13].mxu0 }
 0xb70   :  { %v1432_v52 = vadd.f32 %v3063_v50, %v1431_v41 }
 0xb71   :  { %v1441_v53 = vadd.f32 %v1437_v46, %v1232_v11  ;;  %v3073_v46 = vld [vmem:[%s4413_s28 + $0x1] ss:$0 sm:$0xff] }
 0xb72   :  { %v1440_v54 = vadd.f32 %v1432_v52, %v1231_v9  ;;  %v3084_v9 = vld [vmem:[%s4409_s25 + $0x20] sm:$0xff] }
 0xb73   :  { %v1447_v55 = vsel %vm81_vm0, %v1441_v53, 0.0  ;;  %v3588_v11 = vpack.c.bf16 %v3085_v62, %v3084_v9 }
 0xb74   :  { %1448 = vadd.xlane.f32.xlu1 %v1447_v55  ;;  %v1444_v56 = vsel %vm81_vm0, %v1440_v54, 0.0 }
 0xb75   :  { %1445 = vadd.xlane.f32.xlu0 %v1444_v56  ;;  %3589 = vmatprep.subr.bf16.mxu0 %v3588_v11 }
 0xb76   :  { %3591 = vmatpush3.bf16.msra.mxu0 %v3588_v11 }
 0xb77   :  { %3593 = vmatprep.subr.bf16.mxu0 %v3592_v18 }
 0xb7a   :  { %3595 = vmatpush3.bf16.msra.mxu0 %v3592_v18 }
 0xb7b   :  { %3423 = vmatprep.subr.mxu0 %v3716_v48 }
 0xc01   :  { %v1449_v57 = vpop.xlane.xlu1 %1448 }
 0xc02   :  { %v1451_v58 = vmul.f32 0.03125, %v1449_v57  ;;  %v1446_v59 = vpop.xlane.xlu0 %1445 }
 0xc03   :  { %v1450_v60 = vmul.f32 0.03125, %v1446_v59 }
 0xc04   :  { %v1453_v61 = vsub.f32 %v1441_v53, %v1451_v58 }
 0xc05   :  { %v1452_v0 = vsub.f32 %v1440_v54, %v1450_v60 }
 0xc06   :  { %v1455_v1 = vmul.f32 %v1453_v61, %v1453_v61 }
 0xc07   :  { %v1454_v3 = vmul.f32 %v1452_v0, %v1452_v0 }
 0xc08   :  { %v1459_v4 = vsel %vm81_vm0, %v1455_v1, 0.0 }
 0xc09   :  { %1460 = vadd.xlane.f32.xlu1 %v1459_v4  ;;  %v1456_v5 = vsel %vm81_vm0, %v1454_v3, 0.0 }
 0xc0a   :  { %1457 = vadd.xlane.f32.xlu0 %v1456_v5 }
 0xc96   :  { %v1461_v21 = vpop.xlane.xlu1 %1460 }
 0xc97   :  { %v1463_v22 = vmul.f32 0.03125, %v1461_v21  ;;  %v1458_v23 = vpop.xlane.xlu0 %1457 }
 0xc98   :  { %v1462_v24 = vmul.f32 0.03125, %v1458_v23 }
 0xc99   :  { %v1465_v25 = vadd.f32 1e-05, %v1463_v22 }
 0xc9a   :  { %v1464_v26 = vadd.f32 1e-05, %v1462_v24 }
 0xc9b   :  { %3674 = vrsqrt.f32 %v1465_v25 }
 0xc9c   :  { %3676 = vrsqrt.f32 %v1464_v26 }
 0xca5   :  { %v3675_v27 = vpop.eup %3674 }
 0xca6   :  { %v3677_v29 = vpop.eup %3676  ;;  %v1469_v30 = vmul.f32 %v3675_v27, %v1453_v61 }
 0xca7   :  { %v1468_v31 = vmul.f32 %v3677_v29, %v1452_v0 }
 0xca8   :  { %v1477_v33 = vmul.f32 %v3066_v28, %v1469_v30 }
 0xca9   :  { %v1476_v34 = vmul.f32 %v3066_v28, %v1468_v31 }
 0xcaa   :  { %v4132_v38 = vadd.f32 %v3067_v32, %v1477_v33 }
 0xcab   :  { %v4130_v37 = vadd.f32 %v3067_v32, %v1476_v34 }
 0xcad   :  { %3388 = vmatprep.mubr.msk.f32.mxu1 %vm81_vm0, %v4130_v37  ;;  %3410 = vmatprep.mubr.msk.f32.mxu0 %vm81_vm0, %v4130_v37 }
 0xcae   :  { %3389 = vmatmul.mubr.msk.f32.vlgmr.msra.gmra.mrb[14].mxu1 %vm81_vm0, %v4132_v38  ;;  %3411 = vmatmul.mubr.msk.f32.vlgmr.msra.gmra.mrb[14].mxu0 %vm81_vm0, %v4132_v38 }
 0xcaf   :  { %3583 = vmatpush3.bf16.msra.mxu1 %v3580_v20  ;;  %3399 = vmatprep.mubr.msk.f32.mxu1 %vm81_vm0, %v4130_v37 }
 0xcb0   :  { %3585 = vmatprep.subr.bf16.mxu1 %v3584_v39  ;;  %3425 = vmatprep.mubr.msk.f32.mxu0 %vm3717_vm1, %v3716_v48 }
 0xcb3   :  { %3587 = vmatpush3.bf16.msra.mxu1 %v3584_v39 }
 0xcb4   :  { %3413 = vmatprep.subr.mxu1 %v3716_v48 }
 0xcb6   :  { %3400 = vmatmul.mubr.msk.f32.vlgmr.msra.gmra.mrb[16].mxu1 %vm81_vm0, %v4132_v38 }
 0xcb7   :  { %3415 = vmatprep.mubr.msk.f32.mxu1 %vm3717_vm1, %v3716_v48 }
 0xd81   :  { %v3390_v42 = vpop.f32.mrb[14].mxu1  ;;  %v3412_v43 = vpop.f32.mrb[14].mxu0 }
 0xd82   :  { %v1571_v44 = vpop.f32.mrb[15].mxu1  ;;  %v1747_v45 = vpop.f32.mrb[15].mxu0  ;;  %v1577_v54 = vadd.f32 %v3390_v42, %v3073_v46  ;;  %v4171_v55 = vadd.f32 %v3412_v43, %v3089_v40 }
 0xd83   :  { %v4154_v47 = vadd.f32 %v3089_v40, %v1747_v45  ;;  %v1572_v52 = vadd.f32 %v3073_v46, %v1571_v44 }
 0xd85   :  { %3424 = vmatpush3.msra.mxu0 %v4154_v47 }
 0xd86   :  { %3433 = vmatprep.subr.mxu0 %v3716_v48 }
 0xd89   :  { %v3401_v50 = vpop.f32.mrb[16].mxu1 }
 0xd8a   :  { %v1659_v51 = vpop.f32.mrb[17].mxu1  ;;  %v1665_v53 = vadd.f32 %v3401_v50, %v3081_v49 }
 0xd8b   :  { %v1660_v41 = vadd.f32 %v3081_v49, %v1659_v51 }
 0xd8d   :  { %3414 = vmatpush3.xpose.msk.msra.mxu1 %vm390_vm2, %v1660_v41 }
 0xd8e   :  { %3418 = vmatprep.subr.mxu1 %v3716_v48 }
 0xd90   :  { %3416 = vmatmul.mubr.msk.f32.vlgmr.msra.gmra.mrb[18].mxu1 %vm390_vm2, %v1572_v52 }
 0xd91   :  { %3419 = vmatpush3.xpose.msk.msra.mxu1 %vm390_vm2, %v1665_v53  ;;  %3420 = vmatprep.mubr.msk.f32.mxu1 %vm3717_vm1, %v3716_v48 }
 0xd92   :  { %3428 = vmatprep.subr.mxu1 %v3716_v48 }
 0xd94   :  { %3421 = vmatmul.mubr.msk.f32.vlgmr.msra.gmra.mrb[20].mxu1 %vm390_vm2, %v1577_v54 }
 0xd95   :  { %3429 = vmatpush3.msra.mxu1 %v4171_v55  ;;  %3430 = vmatprep.mubr.msk.f32.mxu1 %vm3717_vm1, %v3716_v48 }
 0xd96   :  { %3438 = vmatprep.subr.mxu1 %v3716_v48 }
 0xe63   :  { %v1828_v56 = vpop.f32.mrb[18].mxu1 }
 0xe64   :  { %v1908_v57 = vmul.f32 0.25, %v1828_v56  ;;  %v3417_v58 = vpop.f32.mrb[19].mxu1 }
 0xe66   :  { %v1910_v59 = vadd.f32 %v1908_v57, %v3955_v10 }
 0xe67   :  { %v1904_v60 = vpop.f32.mrb[20].mxu1 }
 0xe68   :  { %v1909_v61 = vmul.f32 0.25, %v1904_v60  ;;  %v3422_v0 = vpop.f32.mrb[21].mxu1  ;;  %v1912_v1 = vsel %vm580_vm3, %v1910_v59, -inf }
 0xe69   :  { %1913 = vmax.xlane.f32.xlu0 %v1912_v1  ;;  %v3107_v0 = vld [vmem:[%s4371_s10 + $0x38] sm:$0xff] }
 0xe6a   :  { %v1911_v3 = vadd.f32 %v1909_v61, %v3958_v16  ;;  %v3106_v61 = vld [vmem:[%s4371_s10 + $0x30] sm:$0xff] }
 0xe6b   :  { %v3600_v1 = vpack.c.bf16 %v3107_v0, %v3106_v61  ;;  %v3131_v61 = vld [vmem:[%s4376_s16 + $0x78] sm:$0xff] }
 0xe6c   :  { %v1915_v4 = vsel %vm580_vm3, %v1911_v3, -inf }
 0xe6d   :  { %1916 = vmax.xlane.f32.xlu1 %v1915_v4 }
 0xe7e   :  { %2160 = vrot.lane.b32.xlu1 %v1665_v53, %s4415_s3 }
 0xe82   :  { %2080 = vrot.lane.b32.xlu1 %v1572_v52, %s4415_s3 }
 0xef6   :  { %v1914_v5 = vpop.xlane.xlu0 %1913 }
 0xef7   :  { %v1918_v6 = vsub.f32 %v1910_v59, %v1914_v5  ;;  %v3104_v59 = vld [vmem:[%s4371_s10 + $0x20] sm:$0xff] }
 0xef9   :  { %v1920_v7 = vmul.f32 1.442695, %v1918_v6 }
 0xefa   :  { %v1917_v8 = vpop.xlane.xlu1 %1916 }
 0xefb   :  { %3678 = vpow2.f32 %v1920_v7  ;;  %v1919_v9 = vsub.f32 %v1911_v3, %v1917_v8 }
 0xefd   :  { %v1922_v62 = vmul.f32 1.442695, %v1919_v9 }
 0xefe   :  { %v2161_v15 = vpop.permute.xlu1 %2160 }
 0xeff   :  { %3680 = vpow2.f32 %v1922_v62 }
 0xf02   :  { %v2081_v17 = vpop.permute.xlu1 %2080 }
 0xf05   :  { %v3679_v11 = vpop.eup %3678 }
 0xf06   :  { %v1924_v12 = vsel %vm580_vm3, %v3679_v11, 0.0 }
 0xf07   :  { %1925 = vadd.xlane.f32.xlu0 %v1924_v12 }
 0xf09   :  { %v3681_v13 = vpop.eup %3680 }
 0xf0a   :  { %v1927_v14 = vsel %vm580_vm3, %v3681_v13, 0.0 }
 0xf0b   :  { %1928 = vadd.xlane.f32.xlu1 %v1927_v14 }
 0xf1c   :  { %2158 = vrot.lane.b32.xlu1 %v1577_v54, %s4415_s3 }
 0xf1d   :  { %2082 = vrot.lane.b32.xlu0 %v1660_v41, %s4415_s3 }
 0xf94   :  { %v1926_v18 = vpop.xlane.xlu0 %1925 }
 0xf95   :  { %3682 = vrcp.f32 %v1926_v18 }
 0xf98   :  { %v1929_v63 = vpop.xlane.xlu1 %1928  ;;  %v2083_v21 = vpop.permute.xlu0 %2082 }
 0xf99   :  { %3684 = vrcp.f32 %v1929_v63 }
 0xf9c   :  { %v2159_v24 = vpop.permute.xlu1 %2158 }
 0xf9f   :  { %v3683_v19 = vpop.eup %3682 }
 0xfa0   :  { %v1932_v20 = vmul.f32 %v3683_v19, %v3679_v11  ;;  %v3109_v11 = vld [vmem:[%s4372_s11 + $0x1] ss:$0 sm:$0xff] }
 0xfa2   :  { %3426 = vmatmul.mubr.msk.f32.vlgmr.msra.gmra.mrb[16].mxu0 %vm580_vm3, %v1932_v20 }
 0xfa3   :  { %v3685_v22 = vpop.eup %3684  ;;  %3434 = vmatpush3.xpose.msk.msra.mxu0 %vm390_vm2, %v2083_v21  ;;  %3435 = vmatprep.mubr.msk.f32.mxu0 %vm3717_vm1, %v3716_v48 }
 0xfa4   :  { %v1933_v23 = vmul.f32 %v3685_v22, %v3681_v13  ;;  %3443 = vmatprep.subr.mxu0 %v3716_v48 }
 0xfa6   :  { %3431 = vmatmul.mubr.msk.f32.vlgmr.msra.gmra.mrb[22].mxu1 %vm580_vm3, %v1933_v23  ;;  %3436 = vmatmul.mubr.msk.f32.vlgmr.msra.gmra.mrb[18].mxu0 %vm390_vm2, %v2081_v17 }
 0xfa7   :  { %3439 = vmatpush3.xpose.msk.msra.mxu1 %vm390_vm2, %v2161_v15  ;;  %3440 = vmatprep.mubr.msk.f32.mxu1 %vm3717_vm1, %v3716_v48 }
 0xfa8   :  { %3448 = vmatprep.subr.mxu1 %v3716_v48  ;;  %3445 = vmatprep.mubr.msk.f32.mxu0 %vm3717_vm1, %v3716_v48 }
 0xfaa   :  { %3441 = vmatmul.mubr.msk.f32.vlgmr.msra.gmra.mrb[24].mxu1 %vm390_vm2, %v2159_v24 }
 0xfab   :  { %3450 = vmatprep.mubr.msk.f32.mxu1 %vm3717_vm1, %v3716_v48 }
0x1075   :  { %v4204_v25 = vpop.f32.mrb[16].mxu0 }
0x1076   :  { %v3427_v26 = vpop.f32.mrb[17].mxu0 }
0x1079   :  { %v4206_v27 = vpop.f32.mrb[22].mxu1  ;;  %v2154_v28 = vpop.f32.mrb[18].mxu0 }
0x107a   :  { %v2236_v29 = vmul.f32 0.25, %v2154_v28  ;;  %v3432_v30 = vpop.f32.mrb[23].mxu1  ;;  %v3437_v31 = vpop.f32.mrb[19].mxu0 }
0x107b   :  { %v3118_v31 = vld [vmem:[%s4373_s14 + $0x30] sm:$0xff] }
0x107c   :  { %v2238_v32 = vadd.f32 %v2236_v29, %v3955_v10  ;;  %v3117_v29 = vld [vmem:[%s4373_s14 + $0x28] sm:$0xff] }
0x107d   :  { %v2232_v33 = vpop.f32.mrb[24].mxu1 }
0x107e   :  { %v2237_v34 = vmul.f32 0.25, %v2232_v33  ;;  %v3442_v35 = vpop.f32.mrb[25].mxu1  ;;  %v2240_v36 = vsel %vm580_vm3, %v2238_v32, -inf }
0x107f   :  { %2241 = vmax.xlane.f32.xlu0 %v2240_v36 }
0x1080   :  { %v2239_v39 = vadd.f32 %v2237_v34, %v3958_v16 }
0x1082   :  { %v2243_v40 = vsel %vm580_vm3, %v2239_v39, -inf }
0x1083   :  { %2244 = vmax.xlane.f32.xlu1 %v2243_v40 }
0x1094   :  { %2340 = vrot.lane.b32.xlu1 %v4171_v55, %s4415_s3 }
0x110c   :  { %v2242_v42 = vpop.xlane.xlu0 %2241 }
0x110d   :  { %v2246_v43 = vsub.f32 %v2238_v32, %v2242_v42  ;;  %v3119_v32 = vld [vmem:[%s4373_s14 + $0x38] sm:$0xff] }
0x110e   :  { %v3608_v33 = vpack.c.bf16 %v3119_v32, %v3118_v31 }
0x110f   :  { %v2248_v44 = vmul.f32 1.442695, %v2246_v43 }
0x1110   :  { %v2245_v45 = vpop.xlane.xlu1 %2244 }
0x1111   :  { %3686 = vpow2.f32 %v2248_v44  ;;  %v2247_v10 = vsub.f32 %v2239_v39, %v2245_v45  ;;  %v3114_v44 = vld [vmem:[%s4374_s12 + $0x1] ss:$0 sm:$0xff] }
0x1113   :  { %v2250_v49 = vmul.f32 1.442695, %v2247_v10  ;;  %v3115_v10 = vld [vmem:[%s4375_s13 + $0x1] ss:$0 sm:$0xff] }
0x1114   :  { %v2341_v50 = vpop.permute.xlu1 %2340 }
0x1115   :  { %3688 = vpow2.f32 %v2250_v49  ;;  %3449 = vmatpush3.msra.mxu1 %v2341_v50 }
0x111b   :  { %v3687_v51 = vpop.eup %3686 }
0x111c   :  { %v2252_v46 = vsel %vm580_vm3, %v3687_v51, 0.0 }
0x111d   :  { %2253 = vadd.xlane.f32.xlu0 %v2252_v46 }
0x111f   :  { %v3689_v16 = vpop.eup %3688 }
0x1120   :  { %v2255_v41 = vsel %vm580_vm3, %v3689_v16, 0.0 }
0x1121   :  { %2256 = vadd.xlane.f32.xlu0 %v2255_v41 }
0x1137   :  { %2263 = vrot.lane.b32.xlu0 %v4154_v47, %s4415_s3  ;;  %v3105_v47 = vld [vmem:[%s4371_s10 + $0x28] sm:$0xff] }
0x1138   :  { %v3596_v60 = vpack.c.bf16 %v3105_v47, %v3104_v59  ;;  %v3129_v59 = vld [vmem:[%s4376_s16 + $0x68] sm:$0xff] }
0x11aa   :  { %v2254_v52 = vpop.xlane.xlu0 %2253 }
0x11ab   :  { %3690 = vrcp.f32 %v2254_v52  ;;  %v3124_v52 = vld [vmem:[%s4376_s16 + $0x40] sm:$0xff] }
0x11ae   :  { %v2257_v53 = vpop.xlane.xlu0 %2256 }
0x11af   :  { %3692 = vrcp.f32 %v2257_v53  ;;  %v3125_v53 = vld [vmem:[%s4376_s16 + $0x48] sm:$0xff] }
0x11b2   :  { %v2264_v54 = vpop.permute.xlu0 %2263 }
0x11b3   :  { %3444 = vmatpush3.msra.mxu0 %v2264_v54  ;;  %v3612_v54 = vpack.c.bf16 %v3125_v53, %v3124_v52 }
0x11b4   :  { %3597 = vmatprep.subr.bf16.mxu0 %v3596_v60 }
0x11b5   :  { %v3691_v55 = vpop.eup %3690 }
0x11b6   :  { %v2260_v56 = vmul.f32 %v3691_v55, %v3687_v51  ;;  %v3126_v55 = vld [vmem:[%s4376_s16 + $0x50] sm:$0xff] }
0x11b8   :  { %3446 = vmatmul.mubr.msk.f32.vlgmr.msra.gmra.mrb[20].mxu0 %vm580_vm3, %v2260_v56  ;;  %v3127_v56 = vld [vmem:[%s4376_s16 + $0x58] sm:$0xff] }
0x11b9   :  { %v3693_v57 = vpop.eup %3692  ;;  %3599 = vmatpush3.bf16.msra.mxu0 %v3596_v60  ;;  %v3130_v60 = vld [vmem:[%s4376_s16 + $0x70] sm:$0xff] }
0x11ba   :  { %v2261_v58 = vmul.f32 %v3693_v57, %v3689_v16  ;;  %3601 = vmatprep.subr.bf16.mxu0 %v3600_v1  ;;  %v3616_v57 = vpack.c.bf16 %v3127_v56, %v3126_v55  ;;  %v3624_v0 = vpack.c.bf16 %v3131_v61, %v3130_v60  ;;  %v3139_v60 = vld [vmem:[%s4380_s19 + $0x1] ss:$0 sm:$0xff] }
0x11bc   :  { %3451 = vmatmul.mubr.msk.f32.vlgmr.msra.gmra.mrb[26].mxu1 %vm580_vm3, %v2261_v58  ;;  %v3128_v58 = vld [vmem:[%s4376_s16 + $0x60] sm:$0xff] }
0x11bd   :  { %3603 = vmatpush3.bf16.msra.mxu0 %v3600_v1  ;;  %v3620_v47 = vpack.c.bf16 %v3129_v59, %v3128_v58  ;;  %v3121_v1 = vld [vmem:[%s4377_s15 + $0x1] ss:$0 sm:$0xff] }
0x11be   :  { %3613 = vmatprep.subr.bf16.mxu0 %v3612_v54  ;;  %v3138_v58 = vld [vmem:[%s4379_s18 + $0x1] ss:$0 sm:$0xff] }
0x128b   :  { %v2335_v3 = vpop.f32.mrb[20].mxu0 }
0x128c   :  { %2418 = vrot.lane.b32.xlu1 %v2335_v3, %s4416_s26  ;;  %v3447_v4 = vpop.f32.mrb[21].mxu0 }
0x128f   :  { %v2412_v5 = vpop.f32.mrb[26].mxu1 }
0x1290   :  { %2420 = vrot.lane.b32.xlu1 %v2412_v5, %s4416_s26  ;;  %v3452_v6 = vpop.f32.mrb[27].mxu1 }
0x12fe   :  { %v2419_v7 = vpop.permute.xlu1 %2418 }
0x12ff   :  { %v2424_v8 = vsel %vm390_vm2, %v4204_v25, %v2419_v7 }
0x1300   :  { %3461 = vmatprep.mubr.msk.f32.mxu0 %vm81_vm0, %v2424_v8 }
0x1302   :  { %v2421_v9 = vpop.permute.xlu1 %2420 }
0x1303   :  { %v2425_v62 = vsel %vm390_vm2, %v4206_v27, %v2421_v9 }
0x1304   :  { %3462 = vmatmul.mubr.msk.f32.vlgmr.msra.gmra.mrb[22].mxu0 %vm81_vm0, %v2425_v62 }
0x1305   :  { %3615 = vmatpush3.bf16.msra.mxu0 %v3612_v54 }
0x1306   :  { %3617 = vmatprep.subr.bf16.mxu0 %v3616_v57 }
0x1309   :  { %3619 = vmatpush3.bf16.msra.mxu0 %v3616_v57 }
0x130a   :  { %3621 = vmatprep.subr.bf16.mxu0 %v3620_v47 }
0x130d   :  { %3623 = vmatpush3.bf16.msra.mxu0 %v3620_v47 }
0x130e   :  { %3625 = vmatprep.subr.bf16.mxu0 %v3624_v0 }
0x1311   :  { %3627 = vmatpush3.bf16.msra.mxu0 %v3624_v0 }
0x13d7   :  { %v3463_v12 = vpop.f32.mrb[22].mxu0 }
0x13d8   :  { %v2517_v13 = vadd.f32 %v3463_v12, %v3109_v11  ;;  %v2511_v14 = vpop.f32.mrb[23].mxu0 }
0x13d9   :  { %v2512_v15 = vadd.f32 %v3109_v11, %v2511_v14 }
0x13da   :  { %v2521_v17 = vadd.f32 %v2517_v13, %v4132_v38 }
0x13db   :  { %v2520_v18 = vadd.f32 %v2512_v15, %v4130_v37  ;;  %v3116_v37 = vld [vmem:[%s4373_s14 + $0x20] sm:$0xff] }
0x13dc   :  { %v2529_v63 = vsel %vm81_vm0, %v2521_v17, 0.0  ;;  %v3604_v30 = vpack.c.bf16 %v3117_v29, %v3116_v37 }
0x13dd   :  { %2530 = vadd.xlane.f32.xlu1 %v2529_v63  ;;  %v2526_v19 = vsel %vm81_vm0, %v2520_v18, 0.0 }
0x13de   :  { %2527 = vadd.xlane.f32.xlu0 %v2526_v19  ;;  %3605 = vmatprep.subr.bf16.mxu1 %v3604_v30 }
0x13df   :  { %3607 = vmatpush3.bf16.msra.mxu1 %v3604_v30 }
0x13e0   :  { %3609 = vmatprep.subr.bf16.mxu1 %v3608_v33 }
0x13e3   :  { %3611 = vmatpush3.bf16.msra.mxu1 %v3608_v33 }
0x146a   :  { %v2531_v20 = vpop.xlane.xlu1 %2530 }
0x146b   :  { %v2533_v21 = vmul.f32 0.03125, %v2531_v20  ;;  %v2528_v22 = vpop.xlane.xlu0 %2527 }
0x146c   :  { %v2532_v23 = vmul.f32 0.03125, %v2528_v22 }
0x146d   :  { %v2535_v24 = vsub.f32 %v2521_v17, %v2533_v21 }
0x146e   :  { %v2534_v25 = vsub.f32 %v2520_v18, %v2532_v23 }
0x146f   :  { %v2537_v28 = vmul.f32 %v2535_v24, %v2535_v24 }
0x1470   :  { %v2536_v26 = vmul.f32 %v2534_v25, %v2534_v25 }
0x1471   :  { %v2541_v38 = vsel %vm81_vm0, %v2537_v28, 0.0 }
0x1472   :  { %v2538_v27 = vsel %vm81_vm0, %v2536_v26, 0.0 }
0x1473   :  { %2539 = vadd.xlane.f32.xlu0 %v2538_v27 }
0x1477   :  { %2542 = vadd.xlane.f32.xlu0 %v2541_v38 }
0x1500   :  { %v2540_v34 = vpop.xlane.xlu0 %2539 }
0x1501   :  { %v2544_v35 = vmul.f32 0.03125, %v2540_v34 }
0x1503   :  { %v2546_v36 = vadd.f32 1e-05, %v2544_v35 }
0x1504   :  { %v2543_v39 = vpop.xlane.xlu0 %2542 }
0x1505   :  { %3694 = vrsqrt.f32 %v2546_v36  ;;  %v2545_v40 = vmul.f32 0.03125, %v2543_v39 }
0x1507   :  { %v2547_v42 = vadd.f32 1e-05, %v2545_v40 }
0x1509   :  { %3696 = vrsqrt.f32 %v2547_v42 }
0x150f   :  { %v3695_v43 = vpop.eup %3694 }
0x1510   :  { %v2550_v45 = vmul.f32 %v3695_v43, %v2534_v25  ;;  %v3133_v25 = vld [vmem:[%s4378_s17 + $0x1] ss:$0 sm:$0xff] }
0x1512   :  { %v2558_v49 = vmul.f32 %v3114_v44, %v2550_v45  ;;  %v2826_v45 = vld [vmem:[%s4381_s20] sm:$0xff] }
0x1513   :  { %v3697_v50 = vpop.eup %3696 }
0x1514   :  { %v2551_v51 = vmul.f32 %v3697_v50, %v2535_v24  ;;  %v2566_v46 = vadd.f32 %v3115_v10, %v2558_v49  ;;  %v2828_v50 = vld [vmem:[%s4381_s20 + $0x10] sm:$0xff] }
0x1516   :  { %v2559_v16 = vmul.f32 %v3114_v44, %v2551_v51  ;;  %3472 = vmatprep.mubr.msk.f32.mxu1 %vm81_vm0, %v2566_v46  ;;  %v2829_v51 = vld [vmem:[%s4381_s20 + $0x18] sm:$0xff] }
0x1518   :  { %v2567_v41 = vadd.f32 %v3115_v10, %v2559_v16  ;;  %v2827_v10 = vld [vmem:[%s4381_s20 + $0x8] sm:$0xff]  ;;  %v3632_v16 = vpack.c.bf16 %v2829_v51, %v2828_v50 }
0x1519   :  { %v3629_v49 = vpack.c.bf16 %v2827_v10, %v2826_v45 }
0x151a   :  { %3473 = vmatmul.mubr.msk.f32.vlgmr.msra.gmra.mrb[28].mxu1 %vm81_vm0, %v2567_v41 }
0x151b   :  { %3502 = vmatprep.mubr.msk.f32.mxu1 %vm3717_vm1, %v3716_v48 }
0x15ed   :  { %v3474_v3 = vpop.f32.mrb[28].mxu1 }
0x15ee   :  { %v2659_v4 = vadd.f32 %v3474_v3, %v3121_v1  ;;  %v2653_v5 = vpop.f32.mrb[29].mxu1 }
0x15ef   :  { %v2654_v6 = vadd.f32 %v3121_v1, %v2653_v5 }
0x15f0   :  { %v2665_v7 = vmul.f32 0.044715, %v2659_v4  ;;  %v2663_v22 = vmul.f32 0.5, %v2659_v4 }
0x15f1   :  { %v2664_v8 = vmul.f32 0.044715, %v2654_v6  ;;  %v2662_v20 = vmul.f32 0.5, %v2654_v6 }
0x15f2   :  { %v2667_v9 = vmul.f32 %v2665_v7, %v2659_v4  ;;  %v2915_v7 = vld [vmem:[%s4382_s22] sm:$0xff] }
0x15f3   :  { %v2666_v62 = vmul.f32 %v2664_v8, %v2654_v6  ;;  %v2916_v8 = vld [vmem:[%s4382_s22 + $0x8] sm:$0xff] }
0x15f4   :  { %v2669_v11 = vmul.f32 %v2667_v9, %v2659_v4  ;;  %v2917_v9 = vld [vmem:[%s4382_s22 + $0x10] sm:$0xff] }
0x15f5   :  { %v2668_v12 = vmul.f32 %v2666_v62, %v2654_v6  ;;  %v3635_v62 = vpack.c.bf16 %v2916_v8, %v2915_v7 }
0x15f6   :  { %v2671_v13 = vadd.f32 %v2669_v11, %v2659_v4  ;;  %v2918_v11 = vld [vmem:[%s4382_s22 + $0x18] sm:$0xff] }
0x15f7   :  { %v2670_v14 = vadd.f32 %v2668_v12, %v2654_v6  ;;  %v3638_v12 = vpack.c.bf16 %v2918_v11, %v2917_v9 }
0x15f8   :  { %v2673_v15 = vmul.f32 0.7978846, %v2671_v13 }
0x15f9   :  { %v2672_v17 = vmul.f32 0.7978846, %v2670_v14 }
0x15fa   :  { %3698 = vtanh.f32 %v2673_v15 }
0x15fb   :  { %3700 = vtanh.f32 %v2672_v17 }
0x1604   :  { %v3699_v18 = vpop.eup %3698 }
0x1605   :  { %v3701_v63 = vpop.eup %3700  ;;  %v2677_v19 = vadd.f32 1.0, %v3699_v18  ;;  %v3000_v18 = vand.u32 127, %v557_v2 }
0x1606   :  { %v2676_v21 = vadd.f32 1.0, %v3701_v63  ;;  %v3142_v63 = vld [vmem:[%s4384_s23] ss:$0 sm:$0xff] }
0x1607   :  { %v2679_v24 = vmul.f32 %v2677_v19, %v2663_v22  ;;  %vm3001_vm6 = vcmp.lt.s32.totalorder %v3000_v18, 4  ;;  %vm3002_vm8 = vcmp.ge.s32.totalorder %v3000_v18, 4  ;;  %vm3003_vm9 = vcmp.lt.s32.totalorder %v3000_v18, 10 }
0x1608   :  { %v2678_v23 = vmul.f32 %v2676_v21, %v2662_v20  ;;  %vm4350_vm10 = vmand %vm3002_vm8, %vm3003_vm9 }
0x160a   :  { %3491 = vmatprep.mubr.msk.f32.mxu0 %vm1358_vm4, %v2678_v23 }
0x160b   :  { %3492 = vmatmul.mubr.msk.f32.vlgmr.msra.gmra.mrb[24].mxu0 %vm1358_vm4, %v2679_v24 }
0x16de   :  { %v3493_v26 = vpop.f32.mrb[24].mxu0 }
0x16df   :  { %v2775_v27 = vadd.f32 %v3493_v26, %v3133_v25  ;;  %v2769_v28 = vpop.f32.mrb[25].mxu0 }
0x16e0   :  { %v2770_v38 = vadd.f32 %v3133_v25, %v2769_v28 }
0x16e1   :  { %v2779_v37 = vadd.f32 %v2775_v27, %v2567_v41 }
0x16e2   :  { %v2778_v29 = vadd.f32 %v2770_v38, %v2566_v46  ;;  %v3721_v46 = vmov 0.0|0.0  }
0x16e3   :  { %v2787_v30 = vsel %vm81_vm0, %v2779_v37, 0.0  ;;  %3628 = vmatprep.subr.bf16.mxu1 %v3721_v46 }
0x16e4   :  { %2788 = vadd.xlane.f32.xlu0 %v2787_v30  ;;  %v2784_v31 = vsel %vm81_vm0, %v2778_v29, 0.0  ;;  %3630 = vmatpush3.bf16.msra.mxu1 %v3629_v49 }
0x16e5   :  { %2785 = vadd.xlane.f32.xlu1 %v2784_v31  ;;  %3631 = vmatprep.subr.bf16.mxu1 %v3721_v46 }
0x16e8   :  { %3633 = vmatpush3.bf16.msra.mxu1 %v3632_v16 }
0x16e9   :  { %3634 = vmatprep.subr.bf16.mxu1 %v3721_v46 }
0x1771   :  { %v2789_v32 = vpop.xlane.xlu0 %2788 }
0x1772   :  { %v2791_v33 = vmul.f32 0.03125, %v2789_v32  ;;  %v2786_v34 = vpop.xlane.xlu1 %2785 }
0x1773   :  { %v2790_v35 = vmul.f32 0.03125, %v2786_v34 }
0x1774   :  { %v2793_v36 = vsub.f32 %v2779_v37, %v2791_v33 }
0x1775   :  { %v2792_v39 = vsub.f32 %v2778_v29, %v2790_v35 }
0x1776   :  { %v2795_v40 = vmul.f32 %v2793_v36, %v2793_v36 }
0x1777   :  { %v2794_v42 = vmul.f32 %v2792_v39, %v2792_v39 }
0x1778   :  { %v2799_v43 = vsel %vm81_vm0, %v2795_v40, 0.0 }
0x1779   :  { %2800 = vadd.xlane.f32.xlu0 %v2799_v43  ;;  %v2796_v44 = vsel %vm81_vm0, %v2794_v42, 0.0 }
0x177a   :  { %2797 = vadd.xlane.f32.xlu1 %v2796_v44 }
0x1806   :  { %v2801_v41 = vpop.xlane.xlu0 %2800 }
0x1807   :  { %v2803_v52 = vmul.f32 0.03125, %v2801_v41  ;;  %v2798_v53 = vpop.xlane.xlu1 %2797 }
0x1808   :  { %v2802_v54 = vmul.f32 0.03125, %v2798_v53 }
0x1809   :  { %v2805_v55 = vadd.f32 1e-05, %v2803_v52 }
0x180a   :  { %v2804_v56 = vadd.f32 1e-05, %v2802_v54 }
0x180b   :  { %3702 = vrsqrt.f32 %v2805_v55 }
0x180c   :  { %3704 = vrsqrt.f32 %v2804_v56 }
0x1815   :  { %v3703_v57 = vpop.eup %3702 }
0x1816   :  { %v3705_v59 = vpop.eup %3704  ;;  %v2809_v47 = vmul.f32 %v3703_v57, %v2793_v36 }
0x1817   :  { %v2808_v61 = vmul.f32 %v3705_v59, %v2792_v39 }
0x1818   :  { %v2817_v0 = vmul.f32 %v3138_v58, %v2809_v47 }
0x1819   :  { %v2816_v1 = vmul.f32 %v3138_v58, %v2808_v61 }
0x181a   :  { %v2825_v3 = vadd.f32 %v3139_v60, %v2817_v0 }
0x181b   :  { %v2824_v4 = vadd.f32 %v3139_v60, %v2816_v1 }
0x181c   :  { %v2839_v5 = vrot.slane %v2825_v3, 7 }
0x181e   :  { %v2841_v6 = vsel %vm2840_vm5, %v2839_v5, %v2824_v4 }
0x181f   :  { %3503 = vmatmul.mubr.msk.f32.vlgmr.msra.gmra.mrb[30].mxu1 %vm81_vm0, %v2841_v6 }
0x1820   :  { %3513 = vmatprep.mubr.msk.f32.mxu1 %vm3717_vm1, %v3716_v48  ;;  %3636 = vmatpush3.bf16.msra.mxu1 %v3635_v62  ;;  %v3140_v48 = vld [vmem:[%s4383_s21] ss:$0 sm:$0xff] }
0x1821   :  { %3637 = vmatprep.subr.bf16.mxu1 %v3721_v46 }
0x1824   :  { %3639 = vmatpush3.bf16.msra.mxu1 %v3638_v12 }
0x18f2   :  { %v2910_v13 = vpop.f32.mrb[30].mxu1 }
0x18f3   :  { %v2911_v14 = vadd.f32 %v3140_v48, %v2910_v13  ;;  %v3504_v15 = vpop.f32.mrb[31].mxu1 }
0x18f5   :  { %3706 = vtanh.f32 %v2911_v14 }
0x18ff   :  { %v3707_v17 = vpop.eup %3706 }
0x1900   :  { %3514 = vmatmul.mubr.msk.f32.vlgmr.msra.gmra.mrb[32].mxu1 %vm81_vm0, %v3707_v17 }
0x19d3   :  { %v2995_v19 = vpop.f32.mrb[32].mxu1 }
0x19d4   :  { %v2996_v20 = vadd.f32 %v3142_v63, %v2995_v19  ;;  %v3515_v21 = vpop.f32.mrb[33].mxu1 }
0x19d6   :  { %v3018_v22 = vsub.f32 0.0, %v2996_v20  ;;  %v3005_v23 = vsel %vm3001_vm6, %v2996_v20, -1e+30 }
0x19d7   :  { %v3007_v24 = vsel %vm3006_vm7, %v3005_v23, -inf }
0x19d8   :  { %v3019_v25 = vmul.f32 1.442695, %v3018_v22  ;;  %3008 = vmax.xlane.f32.xlu0 %v3007_v24 }
0x19da   :  { %3708 = vpow2.f32 %v3019_v25 }
0x19e4   :  { %v3709_v26 = vpop.eup %3708 }
0x19e5   :  { %v3021_v27 = vadd.f32 1.0, %v3709_v26 }
0x19e7   :  { %3710 = vrcp.f32 %v3021_v27 }
0x19f1   :  { %v3711_v28 = vpop.eup %3710 }
0x19f2   :  { %v3024_v38 = vsel %vm4350_vm10, %v3711_v28, 0.0 }
0x1a65   :  { %v3009_v37 = vpop.xlane.xlu0 %3008 }
0x1a66   :  { %v3010_v29 = vsub.f32 %v3005_v23, %v3009_v37 }
0x1a68   :  { %v3011_v30 = vmul.f32 1.442695, %v3010_v29 }
0x1a6a   :  { %3712 = vpow2.f32 %v3011_v30 }
0x1a74   :  { %v3713_v31 = vpop.eup %3712 }
0x1a75   :  { %v3013_v32 = vsel %vm3006_vm7, %v3713_v31, 0.0 }
0x1a76   :  { %3014 = vadd.xlane.f32.xlu1 %v3013_v32 }
0x1b03   :  { %v3015_v33 = vpop.xlane.xlu1 %3014 }
0x1b04   :  { %3714 = vrcp.f32 %v3015_v33 }
0x1b0e   :  { %v3715_v34 = vpop.eup %3714 }
0x1b0f   :  { %v3017_v35 = vmul.f32 %v3715_v34, %v3713_v31 }
0x1b11   :  { %v3025_v36 = vsel %vm3001_vm6, %v3017_v35, %v3024_v38 }
0x1b12   :  { %3026 = vst [vmem:[%s4385_s24] sm:$0x3] %v3025_v36 }

</bundles_post_ra>
